<compile_context>
chip_gen: v7x
topology: tpu7x:2x2x1
jax: 0.10.0
libtpu: 0.0.40
codegen_flags: <defaults>
</compile_context>

<pallas_src>
import functools
import math

import jax
import jax.numpy as jnp
from jax.experimental import pallas as pl
from jax.experimental.pallas import tpu as pltpu


# ----------------------------------------------------------------------------
# Fused kernel: ALL transformer blocks for one batch-block of Bt sequences.
# ----------------------------------------------------------------------------
def fused_encoder_kernel(num_layers, num_heads, causal,
                         x_ref, pos_ref,
                         wqkv_ref, bqkv_ref, wo_ref, bo_ref,
                         g1_ref, be1_ref, w1_ref, b1_ref, w2_ref, b2_ref,
                         g2_ref, be2_ref,
                         o_ref):
    eps = 1e-5
    Bt, S, D = x_ref.shape
    H = num_heads
    Dh = D // H

    # Positional embedding added once, in-kernel, then flatten rows to [Bt*S, D]
    # so every projection below is a clean 2-D MXU matmul.
    xb = (x_ref[...] + pos_ref[...][None, :, :]).reshape(Bt * S, D)

    # Optional additive causal mask generated in-kernel (no [S,S] HBM DMA).
    # Hoisted out of the layer loop — it is layer-invariant.
    if causal:
        row = jax.lax.broadcasted_iota(jnp.int32, (S, S), 0)
        col = jax.lax.broadcasted_iota(jnp.int32, (S, S), 1)
        mask = jnp.where(col > row, jnp.float32(-1e30), jnp.float32(0.0))
    else:
        mask = None

    def layer_norm(z, g, b):
        mu = jnp.mean(z, axis=-1, keepdims=True)
        var = jnp.mean(jnp.square(z - mu), axis=-1, keepdims=True)
        return (z - mu) * jax.lax.rsqrt(var + eps) * g + b

    for l in range(num_layers):              # static unroll; weights stay in VMEM
        # Fused QKV projection: one [Bt*S, D] x [D, 3D] MXU pass.
        # (1/sqrt(Dh) scale is pre-folded into the Q columns host-side.)
        qkv = jnp.dot(xb, wqkv_ref[l], preferred_element_type=jnp.float32) + bqkv_ref[l]

        per_batch = []
        for b in range(Bt):                  # static unroll over batch elements
            r0 = b * S
            head_outs = []
            for h in range(H):               # static unroll over heads (Dh tiny)
                c = h * Dh
                qh = qkv[r0:r0 + S, c:c + Dh]
                kh = qkv[r0:r0 + S, D + c:D + c + Dh]
                vh = qkv[r0:r0 + S, 2 * D + c:2 * D + c + Dh]
                s = jax.lax.dot_general(qh, kh, (((1,), (1,)), ((), ())),
                                        preferred_element_type=jnp.float32)
                if mask is not None:
                    s = s + mask
                s = s - jnp.max(s, axis=-1, keepdims=True)
                p = jnp.exp(s)
                p = p * pl.reciprocal(jnp.sum(p, axis=-1, keepdims=True), approx=True)
                head_outs.append(jnp.dot(p, vh, preferred_element_type=jnp.float32))
            per_batch.append(jnp.concatenate(head_outs, axis=-1))
        attn = per_batch[0] if Bt == 1 else jnp.concatenate(per_batch, axis=0)

        # Output projection of the attention.
        attn = jnp.dot(attn, wo_ref[l], preferred_element_type=jnp.float32) + bo_ref[l]

        # dropout1 (p=0.0, eval) -> residual -> LayerNorm1
        s1 = layer_norm(attn + xb, g1_ref[l], be1_ref[l])

        # FFN: Linear -> ReLU -> Linear
        h1 = jnp.maximum(
            jnp.dot(s1, w1_ref[l], preferred_element_type=jnp.float32) + b1_ref[l], 0.0)
        h2 = jnp.dot(h1, w2_ref[l], preferred_element_type=jnp.float32) + b2_ref[l]

        # dropout2 (p=0.0, eval) -> residual -> LayerNorm2
        xb = layer_norm(h2 + s1, g2_ref[l], be2_ref[l])

    o_ref[...] = xb.reshape(Bt, S, D).astype(o_ref.dtype)


# ----------------------------------------------------------------------------
# Host-side parameter packing: transpose, fuse QKV + fold scale, stack layers.
# ----------------------------------------------------------------------------
def pack_params(layer_params, num_heads):
    D = layer_params[0][0].shape[1]
    Dh = D // num_heads
    scale = 1.0 / math.sqrt(Dh)

    def fold_qkv_w(w):   # [3D, D] -> [D, 3D], Q columns pre-scaled
        wt = jnp.transpose(w)
        return jnp.concatenate([wt[:, :D] * scale, wt[:, D:]], axis=1)

    def fold_qkv_b(b):   # [1, 3D], Q part pre-scaled
        return jnp.concatenate([b[:, :D] * scale, b[:, D:]], axis=1)

    stk = lambda xs: jnp.stack(xs, axis=0)
    return (
        stk([fold_qkv_w(p[0]) for p in layer_params]),     # wqkv_t [L, D, 3D]
        stk([fold_qkv_b(p[1]) for p in layer_params]),     # bqkv   [L, 1, 3D]
        stk([jnp.transpose(p[2]) for p in layer_params]),  # wo_t   [L, D, D]
        stk([p[3] for p in layer_params]),                 # bo     [L, 1, D]
        stk([p[4] for p in layer_params]),                 # g1     [L, 1, D]
        stk([p[5] for p in layer_params]),                 # be1    [L, 1, D]
        stk([jnp.transpose(p[6]) for p in layer_params]),  # w1_t   [L, D, F]
        stk([p[7] for p in layer_params]),                 # b1     [L, 1, F]
        stk([jnp.transpose(p[8]) for p in layer_params]),  # w2_t   [L, F, D]
        stk([p[9] for p in layer_params]),                 # b2     [L, 1, D]
        stk([p[10] for p in layer_params]),                # g2     [L, 1, D]
        stk([p[11] for p in layer_params]),                # be2    [L, 1, D]
    )


def _const_spec(shape):
    # Constant index_map -> block fetched once, stays resident across the grid.
    if len(shape) == 2:
        return pl.BlockSpec(shape, lambda b: (0, 0))
    return pl.BlockSpec(shape, lambda b: (0, 0, 0))


def transformer_encoder(x, pos_embs, layer_params, num_heads,
                        causal=False, batch_block=1):
    """Forward of TransformerEncoder (all layers fused into one pallas_call)."""
    B, S, D = x.shape
    L = len(layer_params)
    assert B % batch_block == 0, "batch_block must divide batch size"
    packed = pack_params(layer_params, num_heads)

    kernel = functools.partial(fused_encoder_kernel, L, num_heads, causal)
    in_specs = ([pl.BlockSpec((batch_block, S, D), lambda b: (b, 0, 0)),
                 _const_spec((S, D))]
                + [_const_spec(p.shape) for p in packed])

    return pl.pallas_call(
        kernel,
        out_shape=jax.ShapeDtypeStruct((B, S, D), x.dtype),
        grid=(B // batch_block,),
        in_specs=in_specs,
        out_specs=pl.BlockSpec((batch_block, S, D), lambda b: (b, 0, 0)),
        compiler_params=pltpu.CompilerParams(dimension_semantics=("parallel",)),
    )(x, pos_embs, *packed)


# ----------------------------------------------------------------------------
# Deterministic parameter construction (shapes per nn module __init__).
# ----------------------------------------------------------------------------
def sinusoid_pos_emb(seq_len, dim):
    position = jnp.arange(seq_len, dtype=jnp.float32)[:, None]
    div_term = jnp.exp(jnp.arange(0, dim, 2, dtype=jnp.float32) * (-math.log(10000.0) / dim))
    pe = jnp.zeros((seq_len, dim), dtype=jnp.float32)
    pe = pe.at[:, 0::2].set(jnp.sin(position * div_term))
    pe = pe.at[:, 1::2].set(jnp.cos(position * div_term))
    return pe


def make_block_params(key, model_dim):
    D = model_dim
    ks = jax.random.split(key, 8)
    wqkv = 0.1 * jax.random.normal(ks[0], (3 * D, D), jnp.float32)
    bqkv = jnp.zeros((1, 3 * D), jnp.float32)
    wo = 0.1 * jax.random.normal(ks[1], (D, D), jnp.float32)
    bo = jnp.zeros((1, D), jnp.float32)
    g1 = jnp.ones((1, D), jnp.float32)
    be1 = jnp.zeros((1, D), jnp.float32)
    w1 = 0.1 * jax.random.normal(ks[2], (D, D), jnp.float32)   # ffn_dim == model_dim
    b1 = 0.1 * jax.random.normal(ks[3], (1, D), jnp.float32)
    w2 = 0.1 * jax.random.normal(ks[4], (D, D), jnp.float32)
    b2 = 0.1 * jax.random.normal(ks[5], (1, D), jnp.float32)
    g2 = jnp.ones((1, D), jnp.float32)
    be2 = jnp.zeros((1, D), jnp.float32)
    return (wqkv, bqkv, wo, bo, g1, be1, w1, b1, w2, b2, g2, be2)


# ----------------------------------------------------------------------------
# Pure-JAX reference (mirrors PyTorch MHA / LayerNorm / FFN semantics).
# ----------------------------------------------------------------------------
def ref_block(x, mask, params, num_heads):
    (wqkv, bqkv, wo, bo, g1, be1, w1, b1, w2, b2, g2, be2) = params
    B, S, D = x.shape
    Dh = D // num_heads
    qkv = x @ wqkv.T + bqkv[0]
    q, k, v = qkv[..., :D], qkv[..., D:2 * D], qkv[..., 2 * D:]
    q = q.reshape(B, S, num_heads, Dh).transpose(0, 2, 1, 3) / math.sqrt(Dh)
    k = k.reshape(B, S, num_heads, Dh).transpose(0, 2, 1, 3)
    v = v.reshape(B, S, num_heads, Dh).transpose(0, 2, 1, 3)
    s = jnp.einsum("bhqd,bhkd->bhqk", q, k) + mask
    p = jax.nn.softmax(s, axis=-1)
    attn = jnp.einsum("bhqk,bhkd->bhqd", p, v).transpose(0, 2, 1, 3).reshape(B, S, D)
    attn = attn @ wo.T + bo[0]

    def ln(z, g, b):
        mu = jnp.mean(z, -1, keepdims=True)
        var = jnp.mean((z - mu) ** 2, -1, keepdims=True)
        return (z - mu) * jax.lax.rsqrt(var + 1e-5) * g[0] + b[0]

    s1 = ln(attn + x, g1, be1)
    ff = jnp.maximum(s1 @ w1.T + b1[0], 0.0) @ w2.T + b2[0]
    return ln(ff + s1, g2, be2)


def ref_encoder(x, pos, layer_params, num_heads, causal=False):
    B, S, D = x.shape
    x = x + pos[None]
    if causal:
        i = jnp.arange(S)
        mask = jnp.where(i[None, :] > i[:, None], -jnp.inf, 0.0).astype(jnp.float32)
    else:
        mask = jnp.zeros((S, S), jnp.float32)
    for p in layer_params:
        x = ref_block(x, mask, p, num_heads)
    return x


# ----------------------------------------------------------------------------
if __name__ == "__main__":
    B, S, D, H, L = 2, 8, 32, 8, 2   # batch, seq_len, model_dim, heads, layers
    key = jax.random.PRNGKey(0)
    kx, kp = jax.random.split(key)

    x = jax.random.normal(kx, (B, S, D), jnp.float32)
    # position_dim == model_dim so the `x += pos_embs.unsqueeze(0)` add broadcasts.
    pos_embs = sinusoid_pos_emb(S, D)
    layer_params = [make_block_params(k, D) for k in jax.random.split(kp, L)]

    # Path 1: attn_mask=None, one batch element per grid step (splits across TCs).
    out = transformer_encoder(x, pos_embs, layer_params, H, causal=False, batch_block=1)
    out = jax.block_until_ready(out)
    ref = ref_encoder(x, pos_embs, layer_params, H, causal=False)
    assert out.shape == (B, S, D)
    err = float(jnp.max(jnp.abs(out - ref)))
    # 5e-3 tolerance covers the approx-reciprocal softmax normalization.
    assert jnp.allclose(out, ref, atol=5e-3, rtol=5e-3), err

    # Path 2: in-kernel causal mask, whole batch in a single grid step.
    out2 = transformer_encoder(x, pos_embs, layer_params, H, causal=True, batch_block=2)
    out2 = jax.block_until_ready(out2)
    ref2 = ref_encoder(x, pos_embs, layer_params, H, causal=True)
    err2 = float(jnp.max(jnp.abs(out2 - ref2)))
    assert jnp.allclose(out2, ref2, atol=5e-3, rtol=5e-3), err2

    print("KERNEL_OK")
</pallas_src>

<mosaic_0001>
module attributes {stable_mosaic.version = 11 : i64} {
  func.func @fused_encoder_kernel(%arg0: i32, %arg1: memref<1x8x32xf32, #tpu.memory_space<vmem>>, %arg2: memref<8x32xf32, #tpu.memory_space<vmem>>, %arg3: memref<2x32x96xf32, #tpu.memory_space<vmem>>, %arg4: memref<2x1x96xf32, #tpu.memory_space<vmem>>, %arg5: memref<2x32x32xf32, #tpu.memory_space<vmem>>, %arg6: memref<2x1x32xf32, #tpu.memory_space<vmem>>, %arg7: memref<2x1x32xf32, #tpu.memory_space<vmem>>, %arg8: memref<2x1x32xf32, #tpu.memory_space<vmem>>, %arg9: memref<2x32x32xf32, #tpu.memory_space<vmem>>, %arg10: memref<2x1x32xf32, #tpu.memory_space<vmem>>, %arg11: memref<2x32x32xf32, #tpu.memory_space<vmem>>, %arg12: memref<2x1x32xf32, #tpu.memory_space<vmem>>, %arg13: memref<2x1x32xf32, #tpu.memory_space<vmem>>, %arg14: memref<2x1x32xf32, #tpu.memory_space<vmem>>, %arg15: memref<1x8x32xf32, #tpu.memory_space<vmem>>) attributes {dimension_semantics = [#tpu.dimension_semantics<parallel>], iteration_bounds = array<i64: 2>, scalar_prefetch = 0 : i64, scratch_operands = 0 : i64, tpu.core_type = #tpu.core_type<tc>, window_params = [{transform_indices = @transform_0, window_bounds = array<i64: 1, 8, 32>}, {pipeline_mode = #tpu.pipeline_mode<synchronous>, transform_indices = @transform_1, window_bounds = array<i64: 8, 32>}, {pipeline_mode = #tpu.pipeline_mode<synchronous>, transform_indices = @transform_2, window_bounds = array<i64: 2, 32, 96>}, {pipeline_mode = #tpu.pipeline_mode<synchronous>, transform_indices = @transform_3, window_bounds = array<i64: 2, 1, 96>}, {pipeline_mode = #tpu.pipeline_mode<synchronous>, transform_indices = @transform_4, window_bounds = array<i64: 2, 32, 32>}, {pipeline_mode = #tpu.pipeline_mode<synchronous>, transform_indices = @transform_5, window_bounds = array<i64: 2, 1, 32>}, {pipeline_mode = #tpu.pipeline_mode<synchronous>, transform_indices = @transform_6, window_bounds = array<i64: 2, 1, 32>}, {pipeline_mode = #tpu.pipeline_mode<synchronous>, transform_indices = @transform_7, window_bounds = array<i64: 2, 1, 32>}, {pipeline_mode = #tpu.pipeline_mode<synchronous>, transform_indices = @transform_8, window_bounds = array<i64: 2, 32, 32>}, {pipeline_mode = #tpu.pipeline_mode<synchronous>, transform_indices = @transform_9, window_bounds = array<i64: 2, 1, 32>}, {pipeline_mode = #tpu.pipeline_mode<synchronous>, transform_indices = @transform_10, window_bounds = array<i64: 2, 32, 32>}, {pipeline_mode = #tpu.pipeline_mode<synchronous>, transform_indices = @transform_11, window_bounds = array<i64: 2, 1, 32>}, {pipeline_mode = #tpu.pipeline_mode<synchronous>, transform_indices = @transform_12, window_bounds = array<i64: 2, 1, 32>}, {pipeline_mode = #tpu.pipeline_mode<synchronous>, transform_indices = @transform_13, window_bounds = array<i64: 2, 1, 32>}, {transform_indices = @transform_14, window_bounds = array<i64: 1, 8, 32>}]} {
    %c0 = arith.constant 0 : index
    %c0_0 = arith.constant 0 : index
    %c0_1 = arith.constant 0 : index
    %0 = vector.load %arg1[%c0, %c0_0, %c0_1] : memref<1x8x32xf32, #tpu.memory_space<vmem>>, vector<1x8x32xf32>
    %c0_2 = arith.constant 0 : index
    %c0_3 = arith.constant 0 : index
    %1 = vector.load %arg2[%c0_2, %c0_3] : memref<8x32xf32, #tpu.memory_space<vmem>>, vector<8x32xf32>
    %2 = vector.shape_cast %1 : vector<8x32xf32> to vector<1x8x32xf32>
    %3 = arith.addf %0, %2 : vector<1x8x32xf32>
    %4 = vector.shape_cast %3 : vector<1x8x32xf32> to vector<8x32xf32>
    %c0_4 = arith.constant 0 : index
    %c0_5 = arith.constant 0 : index
    %c0_6 = arith.constant 0 : index
    %5 = vector.load %arg3[%c0_4, %c0_5, %c0_6] : memref<2x32x96xf32, #tpu.memory_space<vmem>>, vector<1x32x96xf32>
    %6 = vector.shape_cast %5 : vector<1x32x96xf32> to vector<32x96xf32>
    %cst = arith.constant dense<0.000000e+00> : vector<8x96xf32>
    %7 = tpu.matmul %4, %6, %cst {dimension_numbers = #tpu.dot_dimension_numbers<[1], [0], [0], [1], [0, 0, 1, 1], [], []>} : vector<8x32xf32>, vector<32x96xf32>, vector<8x96xf32> -> vector<8x96xf32>
    %c0_7 = arith.constant 0 : index
    %c0_8 = arith.constant 0 : index
    %c0_9 = arith.constant 0 : index
    %8 = vector.load %arg4[%c0_7, %c0_8, %c0_9] : memref<2x1x96xf32, #tpu.memory_space<vmem>>, vector<1x1x96xf32>
    %9 = vector.shape_cast %8 : vector<1x1x96xf32> to vector<1x96xf32>
    %10 = vector.broadcast %9 : vector<1x96xf32> to vector<8x96xf32>
    %11 = arith.addf %7, %10 : vector<8x96xf32>
    %12 = vector.extract_strided_slice %11 {offsets = [0, 0], sizes = [8, 4], strides = [1, 1]} : vector<8x96xf32> to vector<8x4xf32>
    %13 = vector.extract_strided_slice %11 {offsets = [0, 32], sizes = [8, 4], strides = [1, 1]} : vector<8x96xf32> to vector<8x4xf32>
    %14 = vector.extract_strided_slice %11 {offsets = [0, 64], sizes = [8, 4], strides = [1, 1]} : vector<8x96xf32> to vector<8x4xf32>
    %cst_10 = arith.constant dense<0.000000e+00> : vector<8x8xf32>
    %15 = tpu.matmul %12, %13, %cst_10 {dimension_numbers = #tpu.dot_dimension_numbers<[1], [1], [0], [0], [0, 0, 1, 0], [], []>} : vector<8x4xf32>, vector<8x4xf32>, vector<8x8xf32> -> vector<8x8xf32>
    %cst_11 = arith.constant dense<0xFF800000> : vector<8xf32>
    %16 = vector.multi_reduction <maximumf>, %15, %cst_11 [1] : vector<8x8xf32> to vector<8xf32>
    %17 = vector.shape_cast %16 : vector<8xf32> to vector<8x1xf32>
    %18 = vector.broadcast %17 : vector<8x1xf32> to vector<8x8xf32>
    %19 = arith.subf %15, %18 : vector<8x8xf32>
    %20 = math.exp %19 : vector<8x8xf32>
    %cst_12 = arith.constant dense<0.000000e+00> : vector<8xf32>
    %21 = vector.multi_reduction <add>, %20, %cst_12 [1] : vector<8x8xf32> to vector<8xf32>
    %22 = vector.shape_cast %21 : vector<8xf32> to vector<8x1xf32>
    %23 = tpu.reciprocal %22 {approx = true} : vector<8x1xf32> -> vector<8x1xf32>
    %24 = vector.broadcast %23 : vector<8x1xf32> to vector<8x8xf32>
    %25 = arith.mulf %20, %24 : vector<8x8xf32>
    %cst_13 = arith.constant dense<0.000000e+00> : vector<8x4xf32>
    %26 = tpu.matmul %25, %14, %cst_13 {dimension_numbers = #tpu.dot_dimension_numbers<[1], [0], [0], [1], [0, 0, 1, 1], [], []>} : vector<8x8xf32>, vector<8x4xf32>, vector<8x4xf32> -> vector<8x4xf32>
    %27 = vector.extract_strided_slice %11 {offsets = [0, 4], sizes = [8, 4], strides = [1, 1]} : vector<8x96xf32> to vector<8x4xf32>
    %28 = vector.extract_strided_slice %11 {offsets = [0, 36], sizes = [8, 4], strides = [1, 1]} : vector<8x96xf32> to vector<8x4xf32>
    %29 = vector.extract_strided_slice %11 {offsets = [0, 68], sizes = [8, 4], strides = [1, 1]} : vector<8x96xf32> to vector<8x4xf32>
    %cst_14 = arith.constant dense<0.000000e+00> : vector<8x8xf32>
    %30 = tpu.matmul %27, %28, %cst_14 {dimension_numbers = #tpu.dot_dimension_numbers<[1], [1], [0], [0], [0, 0, 1, 0], [], []>} : vector<8x4xf32>, vector<8x4xf32>, vector<8x8xf32> -> vector<8x8xf32>
    %cst_15 = arith.constant dense<0xFF800000> : vector<8xf32>
    %31 = vector.multi_reduction <maximumf>, %30, %cst_15 [1] : vector<8x8xf32> to vector<8xf32>
    %32 = vector.shape_cast %31 : vector<8xf32> to vector<8x1xf32>
    %33 = vector.broadcast %32 : vector<8x1xf32> to vector<8x8xf32>
    %34 = arith.subf %30, %33 : vector<8x8xf32>
    %35 = math.exp %34 : vector<8x8xf32>
    %cst_16 = arith.constant dense<0.000000e+00> : vector<8xf32>
    %36 = vector.multi_reduction <add>, %35, %cst_16 [1] : vector<8x8xf32> to vector<8xf32>
    %37 = vector.shape_cast %36 : vector<8xf32> to vector<8x1xf32>
    %38 = tpu.reciprocal %37 {approx = true} : vector<8x1xf32> -> vector<8x1xf32>
    %39 = vector.broadcast %38 : vector<8x1xf32> to vector<8x8xf32>
    %40 = arith.mulf %35, %39 : vector<8x8xf32>
    %cst_17 = arith.constant dense<0.000000e+00> : vector<8x4xf32>
    %41 = tpu.matmul %40, %29, %cst_17 {dimension_numbers = #tpu.dot_dimension_numbers<[1], [0], [0], [1], [0, 0, 1, 1], [], []>} : vector<8x8xf32>, vector<8x4xf32>, vector<8x4xf32> -> vector<8x4xf32>
    %42 = vector.extract_strided_slice %11 {offsets = [0, 8], sizes = [8, 4], strides = [1, 1]} : vector<8x96xf32> to vector<8x4xf32>
    %43 = vector.extract_strided_slice %11 {offsets = [0, 40], sizes = [8, 4], strides = [1, 1]} : vector<8x96xf32> to vector<8x4xf32>
    %44 = vector.extract_strided_slice %11 {offsets = [0, 72], sizes = [8, 4], strides = [1, 1]} : vector<8x96xf32> to vector<8x4xf32>
    %cst_18 = arith.constant dense<0.000000e+00> : vector<8x8xf32>
    %45 = tpu.matmul %42, %43, %cst_18 {dimension_numbers = #tpu.dot_dimension_numbers<[1], [1], [0], [0], [0, 0, 1, 0], [], []>} : vector<8x4xf32>, vector<8x4xf32>, vector<8x8xf32> -> vector<8x8xf32>
    %cst_19 = arith.constant dense<0xFF800000> : vector<8xf32>
    %46 = vector.multi_reduction <maximumf>, %45, %cst_19 [1] : vector<8x8xf32> to vector<8xf32>
    %47 = vector.shape_cast %46 : vector<8xf32> to vector<8x1xf32>
    %48 = vector.broadcast %47 : vector<8x1xf32> to vector<8x8xf32>
    %49 = arith.subf %45, %48 : vector<8x8xf32>
    %50 = math.exp %49 : vector<8x8xf32>
    %cst_20 = arith.constant dense<0.000000e+00> : vector<8xf32>
    %51 = vector.multi_reduction <add>, %50, %cst_20 [1] : vector<8x8xf32> to vector<8xf32>
    %52 = vector.shape_cast %51 : vector<8xf32> to vector<8x1xf32>
    %53 = tpu.reciprocal %52 {approx = true} : vector<8x1xf32> -> vector<8x1xf32>
    %54 = vector.broadcast %53 : vector<8x1xf32> to vector<8x8xf32>
    %55 = arith.mulf %50, %54 : vector<8x8xf32>
    %cst_21 = arith.constant dense<0.000000e+00> : vector<8x4xf32>
    %56 = tpu.matmul %55, %44, %cst_21 {dimension_numbers = #tpu.dot_dimension_numbers<[1], [0], [0], [1], [0, 0, 1, 1], [], []>} : vector<8x8xf32>, vector<8x4xf32>, vector<8x4xf32> -> vector<8x4xf32>
    %57 = vector.extract_strided_slice %11 {offsets = [0, 12], sizes = [8, 4], strides = [1, 1]} : vector<8x96xf32> to vector<8x4xf32>
    %58 = vector.extract_strided_slice %11 {offsets = [0, 44], sizes = [8, 4], strides = [1, 1]} : vector<8x96xf32> to vector<8x4xf32>
    %59 = vector.extract_strided_slice %11 {offsets = [0, 76], sizes = [8, 4], strides = [1, 1]} : vector<8x96xf32> to vector<8x4xf32>
    %cst_22 = arith.constant dense<0.000000e+00> : vector<8x8xf32>
    %60 = tpu.matmul %57, %58, %cst_22 {dimension_numbers = #tpu.dot_dimension_numbers<[1], [1], [0], [0], [0, 0, 1, 0], [], []>} : vector<8x4xf32>, vector<8x4xf32>, vector<8x8xf32> -> vector<8x8xf32>
    %cst_23 = arith.constant dense<0xFF800000> : vector<8xf32>
    %61 = vector.multi_reduction <maximumf>, %60, %cst_23 [1] : vector<8x8xf32> to vector<8xf32>
    %62 = vector.shape_cast %61 : vector<8xf32> to vector<8x1xf32>
    %63 = vector.broadcast %62 : vector<8x1xf32> to vector<8x8xf32>
    %64 = arith.subf %60, %63 : vector<8x8xf32>
    %65 = math.exp %64 : vector<8x8xf32>
    %cst_24 = arith.constant dense<0.000000e+00> : vector<8xf32>
    %66 = vector.multi_reduction <add>, %65, %cst_24 [1] : vector<8x8xf32> to vector<8xf32>
    %67 = vector.shape_cast %66 : vector<8xf32> to vector<8x1xf32>
    %68 = tpu.reciprocal %67 {approx = true} : vector<8x1xf32> -> vector<8x1xf32>
    %69 = vector.broadcast %68 : vector<8x1xf32> to vector<8x8xf32>
    %70 = arith.mulf %65, %69 : vector<8x8xf32>
    %cst_25 = arith.constant dense<0.000000e+00> : vector<8x4xf32>
    %71 = tpu.matmul %70, %59, %cst_25 {dimension_numbers = #tpu.dot_dimension_numbers<[1], [0], [0], [1], [0, 0, 1, 1], [], []>} : vector<8x8xf32>, vector<8x4xf32>, vector<8x4xf32> -> vector<8x4xf32>
    %72 = vector.extract_strided_slice %11 {offsets = [0, 16], sizes = [8, 4], strides = [1, 1]} : vector<8x96xf32> to vector<8x4xf32>
    %73 = vector.extract_strided_slice %11 {offsets = [0, 48], sizes = [8, 4], strides = [1, 1]} : vector<8x96xf32> to vector<8x4xf32>
    %74 = vector.extract_strided_slice %11 {offsets = [0, 80], sizes = [8, 4], strides = [1, 1]} : vector<8x96xf32> to vector<8x4xf32>
    %cst_26 = arith.constant dense<0.000000e+00> : vector<8x8xf32>
    %75 = tpu.matmul %72, %73, %cst_26 {dimension_numbers = #tpu.dot_dimension_numbers<[1], [1], [0], [0], [0, 0, 1, 0], [], []>} : vector<8x4xf32>, vector<8x4xf32>, vector<8x8xf32> -> vector<8x8xf32>
    %cst_27 = arith.constant dense<0xFF800000> : vector<8xf32>
    %76 = vector.multi_reduction <maximumf>, %75, %cst_27 [1] : vector<8x8xf32> to vector<8xf32>
    %77 = vector.shape_cast %76 : vector<8xf32> to vector<8x1xf32>
    %78 = vector.broadcast %77 : vector<8x1xf32> to vector<8x8xf32>
    %79 = arith.subf %75, %78 : vector<8x8xf32>
    %80 = math.exp %79 : vector<8x8xf32>
    %cst_28 = arith.constant dense<0.000000e+00> : vector<8xf32>
    %81 = vector.multi_reduction <add>, %80, %cst_28 [1] : vector<8x8xf32> to vector<8xf32>
    %82 = vector.shape_cast %81 : vector<8xf32> to vector<8x1xf32>
    %83 = tpu.reciprocal %82 {approx = true} : vector<8x1xf32> -> vector<8x1xf32>
    %84 = vector.broadcast %83 : vector<8x1xf32> to vector<8x8xf32>
    %85 = arith.mulf %80, %84 : vector<8x8xf32>
    %cst_29 = arith.constant dense<0.000000e+00> : vector<8x4xf32>
    %86 = tpu.matmul %85, %74, %cst_29 {dimension_numbers = #tpu.dot_dimension_numbers<[1], [0], [0], [1], [0, 0, 1, 1], [], []>} : vector<8x8xf32>, vector<8x4xf32>, vector<8x4xf32> -> vector<8x4xf32>
    %87 = vector.extract_strided_slice %11 {offsets = [0, 20], sizes = [8, 4], strides = [1, 1]} : vector<8x96xf32> to vector<8x4xf32>
    %88 = vector.extract_strided_slice %11 {offsets = [0, 52], sizes = [8, 4], strides = [1, 1]} : vector<8x96xf32> to vector<8x4xf32>
    %89 = vector.extract_strided_slice %11 {offsets = [0, 84], sizes = [8, 4], strides = [1, 1]} : vector<8x96xf32> to vector<8x4xf32>
    %cst_30 = arith.constant dense<0.000000e+00> : vector<8x8xf32>
    %90 = tpu.matmul %87, %88, %cst_30 {dimension_numbers = #tpu.dot_dimension_numbers<[1], [1], [0], [0], [0, 0, 1, 0], [], []>} : vector<8x4xf32>, vector<8x4xf32>, vector<8x8xf32> -> vector<8x8xf32>
    %cst_31 = arith.constant dense<0xFF800000> : vector<8xf32>
    %91 = vector.multi_reduction <maximumf>, %90, %cst_31 [1] : vector<8x8xf32> to vector<8xf32>
    %92 = vector.shape_cast %91 : vector<8xf32> to vector<8x1xf32>
    %93 = vector.broadcast %92 : vector<8x1xf32> to vector<8x8xf32>
    %94 = arith.subf %90, %93 : vector<8x8xf32>
    %95 = math.exp %94 : vector<8x8xf32>
    %cst_32 = arith.constant dense<0.000000e+00> : vector<8xf32>
    %96 = vector.multi_reduction <add>, %95, %cst_32 [1] : vector<8x8xf32> to vector<8xf32>
    %97 = vector.shape_cast %96 : vector<8xf32> to vector<8x1xf32>
    %98 = tpu.reciprocal %97 {approx = true} : vector<8x1xf32> -> vector<8x1xf32>
    %99 = vector.broadcast %98 : vector<8x1xf32> to vector<8x8xf32>
    %100 = arith.mulf %95, %99 : vector<8x8xf32>
    %cst_33 = arith.constant dense<0.000000e+00> : vector<8x4xf32>
    %101 = tpu.matmul %100, %89, %cst_33 {dimension_numbers = #tpu.dot_dimension_numbers<[1], [0], [0], [1], [0, 0, 1, 1], [], []>} : vector<8x8xf32>, vector<8x4xf32>, vector<8x4xf32> -> vector<8x4xf32>
    %102 = vector.extract_strided_slice %11 {offsets = [0, 24], sizes = [8, 4], strides = [1, 1]} : vector<8x96xf32> to vector<8x4xf32>
    %103 = vector.extract_strided_slice %11 {offsets = [0, 56], sizes = [8, 4], strides = [1, 1]} : vector<8x96xf32> to vector<8x4xf32>
    %104 = vector.extract_strided_slice %11 {offsets = [0, 88], sizes = [8, 4], strides = [1, 1]} : vector<8x96xf32> to vector<8x4xf32>
    %cst_34 = arith.constant dense<0.000000e+00> : vector<8x8xf32>
    %105 = tpu.matmul %102, %103, %cst_34 {dimension_numbers = #tpu.dot_dimension_numbers<[1], [1], [0], [0], [0, 0, 1, 0], [], []>} : vector<8x4xf32>, vector<8x4xf32>, vector<8x8xf32> -> vector<8x8xf32>
    %cst_35 = arith.constant dense<0xFF800000> : vector<8xf32>
    %106 = vector.multi_reduction <maximumf>, %105, %cst_35 [1] : vector<8x8xf32> to vector<8xf32>
    %107 = vector.shape_cast %106 : vector<8xf32> to vector<8x1xf32>
    %108 = vector.broadcast %107 : vector<8x1xf32> to vector<8x8xf32>
    %109 = arith.subf %105, %108 : vector<8x8xf32>
    %110 = math.exp %109 : vector<8x8xf32>
    %cst_36 = arith.constant dense<0.000000e+00> : vector<8xf32>
    %111 = vector.multi_reduction <add>, %110, %cst_36 [1] : vector<8x8xf32> to vector<8xf32>
    %112 = vector.shape_cast %111 : vector<8xf32> to vector<8x1xf32>
    %113 = tpu.reciprocal %112 {approx = true} : vector<8x1xf32> -> vector<8x1xf32>
    %114 = vector.broadcast %113 : vector<8x1xf32> to vector<8x8xf32>
    %115 = arith.mulf %110, %114 : vector<8x8xf32>
    %cst_37 = arith.constant dense<0.000000e+00> : vector<8x4xf32>
    %116 = tpu.matmul %115, %104, %cst_37 {dimension_numbers = #tpu.dot_dimension_numbers<[1], [0], [0], [1], [0, 0, 1, 1], [], []>} : vector<8x8xf32>, vector<8x4xf32>, vector<8x4xf32> -> vector<8x4xf32>
    %117 = vector.extract_strided_slice %11 {offsets = [0, 28], sizes = [8, 4], strides = [1, 1]} : vector<8x96xf32> to vector<8x4xf32>
    %118 = vector.extract_strided_slice %11 {offsets = [0, 60], sizes = [8, 4], strides = [1, 1]} : vector<8x96xf32> to vector<8x4xf32>
    %119 = vector.extract_strided_slice %11 {offsets = [0, 92], sizes = [8, 4], strides = [1, 1]} : vector<8x96xf32> to vector<8x4xf32>
    %cst_38 = arith.constant dense<0.000000e+00> : vector<8x8xf32>
    %120 = tpu.matmul %117, %118, %cst_38 {dimension_numbers = #tpu.dot_dimension_numbers<[1], [1], [0], [0], [0, 0, 1, 0], [], []>} : vector<8x4xf32>, vector<8x4xf32>, vector<8x8xf32> -> vector<8x8xf32>
    %cst_39 = arith.constant dense<0xFF800000> : vector<8xf32>
    %121 = vector.multi_reduction <maximumf>, %120, %cst_39 [1] : vector<8x8xf32> to vector<8xf32>
    %122 = vector.shape_cast %121 : vector<8xf32> to vector<8x1xf32>
    %123 = vector.broadcast %122 : vector<8x1xf32> to vector<8x8xf32>
    %124 = arith.subf %120, %123 : vector<8x8xf32>
    %125 = math.exp %124 : vector<8x8xf32>
    %cst_40 = arith.constant dense<0.000000e+00> : vector<8xf32>
    %126 = vector.multi_reduction <add>, %125, %cst_40 [1] : vector<8x8xf32> to vector<8xf32>
    %127 = vector.shape_cast %126 : vector<8xf32> to vector<8x1xf32>
    %128 = tpu.reciprocal %127 {approx = true} : vector<8x1xf32> -> vector<8x1xf32>
    %129 = vector.broadcast %128 : vector<8x1xf32> to vector<8x8xf32>
    %130 = arith.mulf %125, %129 : vector<8x8xf32>
    %cst_41 = arith.constant dense<0.000000e+00> : vector<8x4xf32>
    %131 = tpu.matmul %130, %119, %cst_41 {dimension_numbers = #tpu.dot_dimension_numbers<[1], [0], [0], [1], [0, 0, 1, 1], [], []>} : vector<8x8xf32>, vector<8x4xf32>, vector<8x4xf32> -> vector<8x4xf32>
    %132 = tpu.concatenate %26, %41, %56, %71, %86, %101, %116, %131 in 1 : vector<8x4xf32>, vector<8x4xf32>, vector<8x4xf32>, vector<8x4xf32>, vector<8x4xf32>, vector<8x4xf32>, vector<8x4xf32>, vector<8x4xf32> -> vector<8x32xf32>
    %c0_42 = arith.constant 0 : index
    %c0_43 = arith.constant 0 : index
    %c0_44 = arith.constant 0 : index
    %133 = vector.load %arg5[%c0_42, %c0_43, %c0_44] : memref<2x32x32xf32, #tpu.memory_space<vmem>>, vector<1x32x32xf32>
    %134 = vector.shape_cast %133 : vector<1x32x32xf32> to vector<32x32xf32>
    %cst_45 = arith.constant dense<0.000000e+00> : vector<8x32xf32>
    %135 = tpu.matmul %132, %134, %cst_45 {dimension_numbers = #tpu.dot_dimension_numbers<[1], [0], [0], [1], [0, 0, 1, 1], [], []>} : vector<8x32xf32>, vector<32x32xf32>, vector<8x32xf32> -> vector<8x32xf32>
    %c0_46 = arith.constant 0 : index
    %c0_47 = arith.constant 0 : index
    %c0_48 = arith.constant 0 : index
    %136 = vector.load %arg6[%c0_46, %c0_47, %c0_48] : memref<2x1x32xf32, #tpu.memory_space<vmem>>, vector<1x1x32xf32>
    %137 = vector.shape_cast %136 : vector<1x1x32xf32> to vector<1x32xf32>
    %138 = vector.broadcast %137 : vector<1x32xf32> to vector<8x32xf32>
    %139 = arith.addf %135, %138 : vector<8x32xf32>
    %140 = arith.addf %139, %4 : vector<8x32xf32>
    %c0_49 = arith.constant 0 : index
    %c0_50 = arith.constant 0 : index
    %c0_51 = arith.constant 0 : index
    %141 = vector.load %arg7[%c0_49, %c0_50, %c0_51] : memref<2x1x32xf32, #tpu.memory_space<vmem>>, vector<1x1x32xf32>
    %142 = vector.shape_cast %141 : vector<1x1x32xf32> to vector<1x32xf32>
    %c0_52 = arith.constant 0 : index
    %c0_53 = arith.constant 0 : index
    %c0_54 = arith.constant 0 : index
    %143 = vector.load %arg8[%c0_52, %c0_53, %c0_54] : memref<2x1x32xf32, #tpu.memory_space<vmem>>, vector<1x1x32xf32>
    %144 = vector.shape_cast %143 : vector<1x1x32xf32> to vector<1x32xf32>
    %cst_55 = arith.constant dense<0.000000e+00> : vector<8xf32>
    %145 = vector.multi_reduction <add>, %140, %cst_55 [1] : vector<8x32xf32> to vector<8xf32>
    %146 = vector.shape_cast %145 : vector<8xf32> to vector<8x1xf32>
    %cst_56 = arith.constant 3.200000e+01 : f32
    %147 = vector.broadcast %cst_56 : f32 to vector<8x1xf32>
    %148 = arith.divf %146, %147 : vector<8x1xf32>
    %149 = vector.broadcast %148 : vector<8x1xf32> to vector<8x32xf32>
    %150 = arith.subf %140, %149 : vector<8x32xf32>
    %151 = arith.mulf %150, %150 : vector<8x32xf32>
    %cst_57 = arith.constant dense<0.000000e+00> : vector<8xf32>
    %152 = vector.multi_reduction <add>, %151, %cst_57 [1] : vector<8x32xf32> to vector<8xf32>
    %153 = vector.shape_cast %152 : vector<8xf32> to vector<8x1xf32>
    %cst_58 = arith.constant 3.200000e+01 : f32
    %154 = vector.broadcast %cst_58 : f32 to vector<8x1xf32>
    %155 = arith.divf %153, %154 : vector<8x1xf32>
    %156 = vector.broadcast %148 : vector<8x1xf32> to vector<8x32xf32>
    %157 = arith.subf %140, %156 : vector<8x32xf32>
    %cst_59 = arith.constant 9.99999974E-6 : f32
    %158 = vector.broadcast %cst_59 : f32 to vector<8x1xf32>
    %159 = arith.addf %155, %158 : vector<8x1xf32>
    %160 = math.rsqrt %159 : vector<8x1xf32>
    %161 = vector.broadcast %160 : vector<8x1xf32> to vector<8x32xf32>
    %162 = arith.mulf %157, %161 : vector<8x32xf32>
    %163 = vector.broadcast %142 : vector<1x32xf32> to vector<8x32xf32>
    %164 = arith.mulf %162, %163 : vector<8x32xf32>
    %165 = vector.broadcast %144 : vector<1x32xf32> to vector<8x32xf32>
    %166 = arith.addf %164, %165 : vector<8x32xf32>
    %c0_60 = arith.constant 0 : index
    %c0_61 = arith.constant 0 : index
    %c0_62 = arith.constant 0 : index
    %167 = vector.load %arg9[%c0_60, %c0_61, %c0_62] : memref<2x32x32xf32, #tpu.memory_space<vmem>>, vector<1x32x32xf32>
    %168 = vector.shape_cast %167 : vector<1x32x32xf32> to vector<32x32xf32>
    %cst_63 = arith.constant dense<0.000000e+00> : vector<8x32xf32>
    %169 = tpu.matmul %166, %168, %cst_63 {dimension_numbers = #tpu.dot_dimension_numbers<[1], [0], [0], [1], [0, 0, 1, 1], [], []>} : vector<8x32xf32>, vector<32x32xf32>, vector<8x32xf32> -> vector<8x32xf32>
    %c0_64 = arith.constant 0 : index
    %c0_65 = arith.constant 0 : index
    %c0_66 = arith.constant 0 : index
    %170 = vector.load %arg10[%c0_64, %c0_65, %c0_66] : memref<2x1x32xf32, #tpu.memory_space<vmem>>, vector<1x1x32xf32>
    %171 = vector.shape_cast %170 : vector<1x1x32xf32> to vector<1x32xf32>
    %172 = vector.broadcast %171 : vector<1x32xf32> to vector<8x32xf32>
    %173 = arith.addf %169, %172 : vector<8x32xf32>
    %cst_67 = arith.constant 0.000000e+00 : f32
    %174 = vector.broadcast %cst_67 : f32 to vector<8x32xf32>
    %175 = arith.maximumf %173, %174 : vector<8x32xf32>
    %c0_68 = arith.constant 0 : index
    %c0_69 = arith.constant 0 : index
    %c0_70 = arith.constant 0 : index
    %176 = vector.load %arg11[%c0_68, %c0_69, %c0_70] : memref<2x32x32xf32, #tpu.memory_space<vmem>>, vector<1x32x32xf32>
    %177 = vector.shape_cast %176 : vector<1x32x32xf32> to vector<32x32xf32>
    %cst_71 = arith.constant dense<0.000000e+00> : vector<8x32xf32>
    %178 = tpu.matmul %175, %177, %cst_71 {dimension_numbers = #tpu.dot_dimension_numbers<[1], [0], [0], [1], [0, 0, 1, 1], [], []>} : vector<8x32xf32>, vector<32x32xf32>, vector<8x32xf32> -> vector<8x32xf32>
    %c0_72 = arith.constant 0 : index
    %c0_73 = arith.constant 0 : index
    %c0_74 = arith.constant 0 : index
    %179 = vector.load %arg12[%c0_72, %c0_73, %c0_74] : memref<2x1x32xf32, #tpu.memory_space<vmem>>, vector<1x1x32xf32>
    %180 = vector.shape_cast %179 : vector<1x1x32xf32> to vector<1x32xf32>
    %181 = vector.broadcast %180 : vector<1x32xf32> to vector<8x32xf32>
    %182 = arith.addf %178, %181 : vector<8x32xf32>
    %183 = arith.addf %182, %166 : vector<8x32xf32>
    %c0_75 = arith.constant 0 : index
    %c0_76 = arith.constant 0 : index
    %c0_77 = arith.constant 0 : index
    %184 = vector.load %arg13[%c0_75, %c0_76, %c0_77] : memref<2x1x32xf32, #tpu.memory_space<vmem>>, vector<1x1x32xf32>
    %185 = vector.shape_cast %184 : vector<1x1x32xf32> to vector<1x32xf32>
    %c0_78 = arith.constant 0 : index
    %c0_79 = arith.constant 0 : index
    %c0_80 = arith.constant 0 : index
    %186 = vector.load %arg14[%c0_78, %c0_79, %c0_80] : memref<2x1x32xf32, #tpu.memory_space<vmem>>, vector<1x1x32xf32>
    %187 = vector.shape_cast %186 : vector<1x1x32xf32> to vector<1x32xf32>
    %cst_81 = arith.constant dense<0.000000e+00> : vector<8xf32>
    %188 = vector.multi_reduction <add>, %183, %cst_81 [1] : vector<8x32xf32> to vector<8xf32>
    %189 = vector.shape_cast %188 : vector<8xf32> to vector<8x1xf32>
    %cst_82 = arith.constant 3.200000e+01 : f32
    %190 = vector.broadcast %cst_82 : f32 to vector<8x1xf32>
    %191 = arith.divf %189, %190 : vector<8x1xf32>
    %192 = vector.broadcast %191 : vector<8x1xf32> to vector<8x32xf32>
    %193 = arith.subf %183, %192 : vector<8x32xf32>
    %194 = arith.mulf %193, %193 : vector<8x32xf32>
    %cst_83 = arith.constant dense<0.000000e+00> : vector<8xf32>
    %195 = vector.multi_reduction <add>, %194, %cst_83 [1] : vector<8x32xf32> to vector<8xf32>
    %196 = vector.shape_cast %195 : vector<8xf32> to vector<8x1xf32>
    %cst_84 = arith.constant 3.200000e+01 : f32
    %197 = vector.broadcast %cst_84 : f32 to vector<8x1xf32>
    %198 = arith.divf %196, %197 : vector<8x1xf32>
    %199 = vector.broadcast %191 : vector<8x1xf32> to vector<8x32xf32>
    %200 = arith.subf %183, %199 : vector<8x32xf32>
    %cst_85 = arith.constant 9.99999974E-6 : f32
    %201 = vector.broadcast %cst_85 : f32 to vector<8x1xf32>
    %202 = arith.addf %198, %201 : vector<8x1xf32>
    %203 = math.rsqrt %202 : vector<8x1xf32>
    %204 = vector.broadcast %203 : vector<8x1xf32> to vector<8x32xf32>
    %205 = arith.mulf %200, %204 : vector<8x32xf32>
    %206 = vector.broadcast %185 : vector<1x32xf32> to vector<8x32xf32>
    %207 = arith.mulf %205, %206 : vector<8x32xf32>
    %208 = vector.broadcast %187 : vector<1x32xf32> to vector<8x32xf32>
    %209 = arith.addf %207, %208 : vector<8x32xf32>
    %c1 = arith.constant 1 : index
    %c0_86 = arith.constant 0 : index
    %c0_87 = arith.constant 0 : index
    %210 = vector.load %arg3[%c1, %c0_86, %c0_87] : memref<2x32x96xf32, #tpu.memory_space<vmem>>, vector<1x32x96xf32>
    %211 = vector.shape_cast %210 : vector<1x32x96xf32> to vector<32x96xf32>
    %cst_88 = arith.constant dense<0.000000e+00> : vector<8x96xf32>
    %212 = tpu.matmul %209, %211, %cst_88 {dimension_numbers = #tpu.dot_dimension_numbers<[1], [0], [0], [1], [0, 0, 1, 1], [], []>} : vector<8x32xf32>, vector<32x96xf32>, vector<8x96xf32> -> vector<8x96xf32>
    %c1_89 = arith.constant 1 : index
    %c0_90 = arith.constant 0 : index
    %c0_91 = arith.constant 0 : index
    %213 = vector.load %arg4[%c1_89, %c0_90, %c0_91] : memref<2x1x96xf32, #tpu.memory_space<vmem>>, vector<1x1x96xf32>
    %214 = vector.shape_cast %213 : vector<1x1x96xf32> to vector<1x96xf32>
    %215 = vector.broadcast %214 : vector<1x96xf32> to vector<8x96xf32>
    %216 = arith.addf %212, %215 : vector<8x96xf32>
    %217 = vector.extract_strided_slice %216 {offsets = [0, 0], sizes = [8, 4], strides = [1, 1]} : vector<8x96xf32> to vector<8x4xf32>
    %218 = vector.extract_strided_slice %216 {offsets = [0, 32], sizes = [8, 4], strides = [1, 1]} : vector<8x96xf32> to vector<8x4xf32>
    %219 = vector.extract_strided_slice %216 {offsets = [0, 64], sizes = [8, 4], strides = [1, 1]} : vector<8x96xf32> to vector<8x4xf32>
    %cst_92 = arith.constant dense<0.000000e+00> : vector<8x8xf32>
    %220 = tpu.matmul %217, %218, %cst_92 {dimension_numbers = #tpu.dot_dimension_numbers<[1], [1], [0], [0], [0, 0, 1, 0], [], []>} : vector<8x4xf32>, vector<8x4xf32>, vector<8x8xf32> -> vector<8x8xf32>
    %cst_93 = arith.constant dense<0xFF800000> : vector<8xf32>
    %221 = vector.multi_reduction <maximumf>, %220, %cst_93 [1] : vector<8x8xf32> to vector<8xf32>
    %222 = vector.shape_cast %221 : vector<8xf32> to vector<8x1xf32>
    %223 = vector.broadcast %222 : vector<8x1xf32> to vector<8x8xf32>
    %224 = arith.subf %220, %223 : vector<8x8xf32>
    %225 = math.exp %224 : vector<8x8xf32>
    %cst_94 = arith.constant dense<0.000000e+00> : vector<8xf32>
    %226 = vector.multi_reduction <add>, %225, %cst_94 [1] : vector<8x8xf32> to vector<8xf32>
    %227 = vector.shape_cast %226 : vector<8xf32> to vector<8x1xf32>
    %228 = tpu.reciprocal %227 {approx = true} : vector<8x1xf32> -> vector<8x1xf32>
    %229 = vector.broadcast %228 : vector<8x1xf32> to vector<8x8xf32>
    %230 = arith.mulf %225, %229 : vector<8x8xf32>
    %cst_95 = arith.constant dense<0.000000e+00> : vector<8x4xf32>
    %231 = tpu.matmul %230, %219, %cst_95 {dimension_numbers = #tpu.dot_dimension_numbers<[1], [0], [0], [1], [0, 0, 1, 1], [], []>} : vector<8x8xf32>, vector<8x4xf32>, vector<8x4xf32> -> vector<8x4xf32>
    %232 = vector.extract_strided_slice %216 {offsets = [0, 4], sizes = [8, 4], strides = [1, 1]} : vector<8x96xf32> to vector<8x4xf32>
    %233 = vector.extract_strided_slice %216 {offsets = [0, 36], sizes = [8, 4], strides = [1, 1]} : vector<8x96xf32> to vector<8x4xf32>
    %234 = vector.extract_strided_slice %216 {offsets = [0, 68], sizes = [8, 4], strides = [1, 1]} : vector<8x96xf32> to vector<8x4xf32>
    %cst_96 = arith.constant dense<0.000000e+00> : vector<8x8xf32>
    %235 = tpu.matmul %232, %233, %cst_96 {dimension_numbers = #tpu.dot_dimension_numbers<[1], [1], [0], [0], [0, 0, 1, 0], [], []>} : vector<8x4xf32>, vector<8x4xf32>, vector<8x8xf32> -> vector<8x8xf32>
    %cst_97 = arith.constant dense<0xFF800000> : vector<8xf32>
    %236 = vector.multi_reduction <maximumf>, %235, %cst_97 [1] : vector<8x8xf32> to vector<8xf32>
    %237 = vector.shape_cast %236 : vector<8xf32> to vector<8x1xf32>
    %238 = vector.broadcast %237 : vector<8x1xf32> to vector<8x8xf32>
    %239 = arith.subf %235, %238 : vector<8x8xf32>
    %240 = math.exp %239 : vector<8x8xf32>
    %cst_98 = arith.constant dense<0.000000e+00> : vector<8xf32>
    %241 = vector.multi_reduction <add>, %240, %cst_98 [1] : vector<8x8xf32> to vector<8xf32>
    %242 = vector.shape_cast %241 : vector<8xf32> to vector<8x1xf32>
    %243 = tpu.reciprocal %242 {approx = true} : vector<8x1xf32> -> vector<8x1xf32>
    %244 = vector.broadcast %243 : vector<8x1xf32> to vector<8x8xf32>
    %245 = arith.mulf %240, %244 : vector<8x8xf32>
    %cst_99 = arith.constant dense<0.000000e+00> : vector<8x4xf32>
    %246 = tpu.matmul %245, %234, %cst_99 {dimension_numbers = #tpu.dot_dimension_numbers<[1], [0], [0], [1], [0, 0, 1, 1], [], []>} : vector<8x8xf32>, vector<8x4xf32>, vector<8x4xf32> -> vector<8x4xf32>
    %247 = vector.extract_strided_slice %216 {offsets = [0, 8], sizes = [8, 4], strides = [1, 1]} : vector<8x96xf32> to vector<8x4xf32>
    %248 = vector.extract_strided_slice %216 {offsets = [0, 40], sizes = [8, 4], strides = [1, 1]} : vector<8x96xf32> to vector<8x4xf32>
    %249 = vector.extract_strided_slice %216 {offsets = [0, 72], sizes = [8, 4], strides = [1, 1]} : vector<8x96xf32> to vector<8x4xf32>
    %cst_100 = arith.constant dense<0.000000e+00> : vector<8x8xf32>
    %250 = tpu.matmul %247, %248, %cst_100 {dimension_numbers = #tpu.dot_dimension_numbers<[1], [1], [0], [0], [0, 0, 1, 0], [], []>} : vector<8x4xf32>, vector<8x4xf32>, vector<8x8xf32> -> vector<8x8xf32>
    %cst_101 = arith.constant dense<0xFF800000> : vector<8xf32>
    %251 = vector.multi_reduction <maximumf>, %250, %cst_101 [1] : vector<8x8xf32> to vector<8xf32>
    %252 = vector.shape_cast %251 : vector<8xf32> to vector<8x1xf32>
    %253 = vector.broadcast %252 : vector<8x1xf32> to vector<8x8xf32>
    %254 = arith.subf %250, %253 : vector<8x8xf32>
    %255 = math.exp %254 : vector<8x8xf32>
    %cst_102 = arith.constant dense<0.000000e+00> : vector<8xf32>
    %256 = vector.multi_reduction <add>, %255, %cst_102 [1] : vector<8x8xf32> to vector<8xf32>
    %257 = vector.shape_cast %256 : vector<8xf32> to vector<8x1xf32>
    %258 = tpu.reciprocal %257 {approx = true} : vector<8x1xf32> -> vector<8x1xf32>
    %259 = vector.broadcast %258 : vector<8x1xf32> to vector<8x8xf32>
    %260 = arith.mulf %255, %259 : vector<8x8xf32>
    %cst_103 = arith.constant dense<0.000000e+00> : vector<8x4xf32>
    %261 = tpu.matmul %260, %249, %cst_103 {dimension_numbers = #tpu.dot_dimension_numbers<[1], [0], [0], [1], [0, 0, 1, 1], [], []>} : vector<8x8xf32>, vector<8x4xf32>, vector<8x4xf32> -> vector<8x4xf32>
    %262 = vector.extract_strided_slice %216 {offsets = [0, 12], sizes = [8, 4], strides = [1, 1]} : vector<8x96xf32> to vector<8x4xf32>
    %263 = vector.extract_strided_slice %216 {offsets = [0, 44], sizes = [8, 4], strides = [1, 1]} : vector<8x96xf32> to vector<8x4xf32>
    %264 = vector.extract_strided_slice %216 {offsets = [0, 76], sizes = [8, 4], strides = [1, 1]} : vector<8x96xf32> to vector<8x4xf32>
    %cst_104 = arith.constant dense<0.000000e+00> : vector<8x8xf32>
    %265 = tpu.matmul %262, %263, %cst_104 {dimension_numbers = #tpu.dot_dimension_numbers<[1], [1], [0], [0], [0, 0, 1, 0], [], []>} : vector<8x4xf32>, vector<8x4xf32>, vector<8x8xf32> -> vector<8x8xf32>
    %cst_105 = arith.constant dense<0xFF800000> : vector<8xf32>
    %266 = vector.multi_reduction <maximumf>, %265, %cst_105 [1] : vector<8x8xf32> to vector<8xf32>
    %267 = vector.shape_cast %266 : vector<8xf32> to vector<8x1xf32>
    %268 = vector.broadcast %267 : vector<8x1xf32> to vector<8x8xf32>
    %269 = arith.subf %265, %268 : vector<8x8xf32>
    %270 = math.exp %269 : vector<8x8xf32>
    %cst_106 = arith.constant dense<0.000000e+00> : vector<8xf32>
    %271 = vector.multi_reduction <add>, %270, %cst_106 [1] : vector<8x8xf32> to vector<8xf32>
    %272 = vector.shape_cast %271 : vector<8xf32> to vector<8x1xf32>
    %273 = tpu.reciprocal %272 {approx = true} : vector<8x1xf32> -> vector<8x1xf32>
    %274 = vector.broadcast %273 : vector<8x1xf32> to vector<8x8xf32>
    %275 = arith.mulf %270, %274 : vector<8x8xf32>
    %cst_107 = arith.constant dense<0.000000e+00> : vector<8x4xf32>
    %276 = tpu.matmul %275, %264, %cst_107 {dimension_numbers = #tpu.dot_dimension_numbers<[1], [0], [0], [1], [0, 0, 1, 1], [], []>} : vector<8x8xf32>, vector<8x4xf32>, vector<8x4xf32> -> vector<8x4xf32>
    %277 = vector.extract_strided_slice %216 {offsets = [0, 16], sizes = [8, 4], strides = [1, 1]} : vector<8x96xf32> to vector<8x4xf32>
    %278 = vector.extract_strided_slice %216 {offsets = [0, 48], sizes = [8, 4], strides = [1, 1]} : vector<8x96xf32> to vector<8x4xf32>
    %279 = vector.extract_strided_slice %216 {offsets = [0, 80], sizes = [8, 4], strides = [1, 1]} : vector<8x96xf32> to vector<8x4xf32>
    %cst_108 = arith.constant dense<0.000000e+00> : vector<8x8xf32>
    %280 = tpu.matmul %277, %278, %cst_108 {dimension_numbers = #tpu.dot_dimension_numbers<[1], [1], [0], [0], [0, 0, 1, 0], [], []>} : vector<8x4xf32>, vector<8x4xf32>, vector<8x8xf32> -> vector<8x8xf32>
    %cst_109 = arith.constant dense<0xFF800000> : vector<8xf32>
    %281 = vector.multi_reduction <maximumf>, %280, %cst_109 [1] : vector<8x8xf32> to vector<8xf32>
    %282 = vector.shape_cast %281 : vector<8xf32> to vector<8x1xf32>
    %283 = vector.broadcast %282 : vector<8x1xf32> to vector<8x8xf32>
    %284 = arith.subf %280, %283 : vector<8x8xf32>
    %285 = math.exp %284 : vector<8x8xf32>
    %cst_110 = arith.constant dense<0.000000e+00> : vector<8xf32>
    %286 = vector.multi_reduction <add>, %285, %cst_110 [1] : vector<8x8xf32> to vector<8xf32>
    %287 = vector.shape_cast %286 : vector<8xf32> to vector<8x1xf32>
    %288 = tpu.reciprocal %287 {approx = true} : vector<8x1xf32> -> vector<8x1xf32>
    %289 = vector.broadcast %288 : vector<8x1xf32> to vector<8x8xf32>
    %290 = arith.mulf %285, %289 : vector<8x8xf32>
    %cst_111 = arith.constant dense<0.000000e+00> : vector<8x4xf32>
    %291 = tpu.matmul %290, %279, %cst_111 {dimension_numbers = #tpu.dot_dimension_numbers<[1], [0], [0], [1], [0, 0, 1, 1], [], []>} : vector<8x8xf32>, vector<8x4xf32>, vector<8x4xf32> -> vector<8x4xf32>
    %292 = vector.extract_strided_slice %216 {offsets = [0, 20], sizes = [8, 4], strides = [1, 1]} : vector<8x96xf32> to vector<8x4xf32>
    %293 = vector.extract_strided_slice %216 {offsets = [0, 52], sizes = [8, 4], strides = [1, 1]} : vector<8x96xf32> to vector<8x4xf32>
    %294 = vector.extract_strided_slice %216 {offsets = [0, 84], sizes = [8, 4], strides = [1, 1]} : vector<8x96xf32> to vector<8x4xf32>
    %cst_112 = arith.constant dense<0.000000e+00> : vector<8x8xf32>
    %295 = tpu.matmul %292, %293, %cst_112 {dimension_numbers = #tpu.dot_dimension_numbers<[1], [1], [0], [0], [0, 0, 1, 0], [], []>} : vector<8x4xf32>, vector<8x4xf32>, vector<8x8xf32> -> vector<8x8xf32>
    %cst_113 = arith.constant dense<0xFF800000> : vector<8xf32>
    %296 = vector.multi_reduction <maximumf>, %295, %cst_113 [1] : vector<8x8xf32> to vector<8xf32>
    %297 = vector.shape_cast %296 : vector<8xf32> to vector<8x1xf32>
    %298 = vector.broadcast %297 : vector<8x1xf32> to vector<8x8xf32>
    %299 = arith.subf %295, %298 : vector<8x8xf32>
    %300 = math.exp %299 : vector<8x8xf32>
    %cst_114 = arith.constant dense<0.000000e+00> : vector<8xf32>
    %301 = vector.multi_reduction <add>, %300, %cst_114 [1] : vector<8x8xf32> to vector<8xf32>
    %302 = vector.shape_cast %301 : vector<8xf32> to vector<8x1xf32>
    %303 = tpu.reciprocal %302 {approx = true} : vector<8x1xf32> -> vector<8x1xf32>
    %304 = vector.broadcast %303 : vector<8x1xf32> to vector<8x8xf32>
    %305 = arith.mulf %300, %304 : vector<8x8xf32>
    %cst_115 = arith.constant dense<0.000000e+00> : vector<8x4xf32>
    %306 = tpu.matmul %305, %294, %cst_115 {dimension_numbers = #tpu.dot_dimension_numbers<[1], [0], [0], [1], [0, 0, 1, 1], [], []>} : vector<8x8xf32>, vector<8x4xf32>, vector<8x4xf32> -> vector<8x4xf32>
    %307 = vector.extract_strided_slice %216 {offsets = [0, 24], sizes = [8, 4], strides = [1, 1]} : vector<8x96xf32> to vector<8x4xf32>
    %308 = vector.extract_strided_slice %216 {offsets = [0, 56], sizes = [8, 4], strides = [1, 1]} : vector<8x96xf32> to vector<8x4xf32>
    %309 = vector.extract_strided_slice %216 {offsets = [0, 88], sizes = [8, 4], strides = [1, 1]} : vector<8x96xf32> to vector<8x4xf32>
    %cst_116 = arith.constant dense<0.000000e+00> : vector<8x8xf32>
    %310 = tpu.matmul %307, %308, %cst_116 {dimension_numbers = #tpu.dot_dimension_numbers<[1], [1], [0], [0], [0, 0, 1, 0], [], []>} : vector<8x4xf32>, vector<8x4xf32>, vector<8x8xf32> -> vector<8x8xf32>
    %cst_117 = arith.constant dense<0xFF800000> : vector<8xf32>
    %311 = vector.multi_reduction <maximumf>, %310, %cst_117 [1] : vector<8x8xf32> to vector<8xf32>
    %312 = vector.shape_cast %311 : vector<8xf32> to vector<8x1xf32>
    %313 = vector.broadcast %312 : vector<8x1xf32> to vector<8x8xf32>
    %314 = arith.subf %310, %313 : vector<8x8xf32>
    %315 = math.exp %314 : vector<8x8xf32>
    %cst_118 = arith.constant dense<0.000000e+00> : vector<8xf32>
    %316 = vector.multi_reduction <add>, %315, %cst_118 [1] : vector<8x8xf32> to vector<8xf32>
    %317 = vector.shape_cast %316 : vector<8xf32> to vector<8x1xf32>
    %318 = tpu.reciprocal %317 {approx = true} : vector<8x1xf32> -> vector<8x1xf32>
    %319 = vector.broadcast %318 : vector<8x1xf32> to vector<8x8xf32>
    %320 = arith.mulf %315, %319 : vector<8x8xf32>
    %cst_119 = arith.constant dense<0.000000e+00> : vector<8x4xf32>
    %321 = tpu.matmul %320, %309, %cst_119 {dimension_numbers = #tpu.dot_dimension_numbers<[1], [0], [0], [1], [0, 0, 1, 1], [], []>} : vector<8x8xf32>, vector<8x4xf32>, vector<8x4xf32> -> vector<8x4xf32>
    %322 = vector.extract_strided_slice %216 {offsets = [0, 28], sizes = [8, 4], strides = [1, 1]} : vector<8x96xf32> to vector<8x4xf32>
    %323 = vector.extract_strided_slice %216 {offsets = [0, 60], sizes = [8, 4], strides = [1, 1]} : vector<8x96xf32> to vector<8x4xf32>
    %324 = vector.extract_strided_slice %216 {offsets = [0, 92], sizes = [8, 4], strides = [1, 1]} : vector<8x96xf32> to vector<8x4xf32>
    %cst_120 = arith.constant dense<0.000000e+00> : vector<8x8xf32>
    %325 = tpu.matmul %322, %323, %cst_120 {dimension_numbers = #tpu.dot_dimension_numbers<[1], [1], [0], [0], [0, 0, 1, 0], [], []>} : vector<8x4xf32>, vector<8x4xf32>, vector<8x8xf32> -> vector<8x8xf32>
    %cst_121 = arith.constant dense<0xFF800000> : vector<8xf32>
    %326 = vector.multi_reduction <maximumf>, %325, %cst_121 [1] : vector<8x8xf32> to vector<8xf32>
    %327 = vector.shape_cast %326 : vector<8xf32> to vector<8x1xf32>
    %328 = vector.broadcast %327 : vector<8x1xf32> to vector<8x8xf32>
    %329 = arith.subf %325, %328 : vector<8x8xf32>
    %330 = math.exp %329 : vector<8x8xf32>
    %cst_122 = arith.constant dense<0.000000e+00> : vector<8xf32>
    %331 = vector.multi_reduction <add>, %330, %cst_122 [1] : vector<8x8xf32> to vector<8xf32>
    %332 = vector.shape_cast %331 : vector<8xf32> to vector<8x1xf32>
    %333 = tpu.reciprocal %332 {approx = true} : vector<8x1xf32> -> vector<8x1xf32>
    %334 = vector.broadcast %333 : vector<8x1xf32> to vector<8x8xf32>
    %335 = arith.mulf %330, %334 : vector<8x8xf32>
    %cst_123 = arith.constant dense<0.000000e+00> : vector<8x4xf32>
    %336 = tpu.matmul %335, %324, %cst_123 {dimension_numbers = #tpu.dot_dimension_numbers<[1], [0], [0], [1], [0, 0, 1, 1], [], []>} : vector<8x8xf32>, vector<8x4xf32>, vector<8x4xf32> -> vector<8x4xf32>
    %337 = tpu.concatenate %231, %246, %261, %276, %291, %306, %321, %336 in 1 : vector<8x4xf32>, vector<8x4xf32>, vector<8x4xf32>, vector<8x4xf32>, vector<8x4xf32>, vector<8x4xf32>, vector<8x4xf32>, vector<8x4xf32> -> vector<8x32xf32>
    %c1_124 = arith.constant 1 : index
    %c0_125 = arith.constant 0 : index
    %c0_126 = arith.constant 0 : index
    %338 = vector.load %arg5[%c1_124, %c0_125, %c0_126] : memref<2x32x32xf32, #tpu.memory_space<vmem>>, vector<1x32x32xf32>
    %339 = vector.shape_cast %338 : vector<1x32x32xf32> to vector<32x32xf32>
    %cst_127 = arith.constant dense<0.000000e+00> : vector<8x32xf32>
    %340 = tpu.matmul %337, %339, %cst_127 {dimension_numbers = #tpu.dot_dimension_numbers<[1], [0], [0], [1], [0, 0, 1, 1], [], []>} : vector<8x32xf32>, vector<32x32xf32>, vector<8x32xf32> -> vector<8x32xf32>
    %c1_128 = arith.constant 1 : index
    %c0_129 = arith.constant 0 : index
    %c0_130 = arith.constant 0 : index
    %341 = vector.load %arg6[%c1_128, %c0_129, %c0_130] : memref<2x1x32xf32, #tpu.memory_space<vmem>>, vector<1x1x32xf32>
    %342 = vector.shape_cast %341 : vector<1x1x32xf32> to vector<1x32xf32>
    %343 = vector.broadcast %342 : vector<1x32xf32> to vector<8x32xf32>
    %344 = arith.addf %340, %343 : vector<8x32xf32>
    %345 = arith.addf %344, %209 : vector<8x32xf32>
    %c1_131 = arith.constant 1 : index
    %c0_132 = arith.constant 0 : index
    %c0_133 = arith.constant 0 : index
    %346 = vector.load %arg7[%c1_131, %c0_132, %c0_133] : memref<2x1x32xf32, #tpu.memory_space<vmem>>, vector<1x1x32xf32>
    %347 = vector.shape_cast %346 : vector<1x1x32xf32> to vector<1x32xf32>
    %c1_134 = arith.constant 1 : index
    %c0_135 = arith.constant 0 : index
    %c0_136 = arith.constant 0 : index
    %348 = vector.load %arg8[%c1_134, %c0_135, %c0_136] : memref<2x1x32xf32, #tpu.memory_space<vmem>>, vector<1x1x32xf32>
    %349 = vector.shape_cast %348 : vector<1x1x32xf32> to vector<1x32xf32>
    %cst_137 = arith.constant dense<0.000000e+00> : vector<8xf32>
    %350 = vector.multi_reduction <add>, %345, %cst_137 [1] : vector<8x32xf32> to vector<8xf32>
    %351 = vector.shape_cast %350 : vector<8xf32> to vector<8x1xf32>
    %cst_138 = arith.constant 3.200000e+01 : f32
    %352 = vector.broadcast %cst_138 : f32 to vector<8x1xf32>
    %353 = arith.divf %351, %352 : vector<8x1xf32>
    %354 = vector.broadcast %353 : vector<8x1xf32> to vector<8x32xf32>
    %355 = arith.subf %345, %354 : vector<8x32xf32>
    %356 = arith.mulf %355, %355 : vector<8x32xf32>
    %cst_139 = arith.constant dense<0.000000e+00> : vector<8xf32>
    %357 = vector.multi_reduction <add>, %356, %cst_139 [1] : vector<8x32xf32> to vector<8xf32>
    %358 = vector.shape_cast %357 : vector<8xf32> to vector<8x1xf32>
    %cst_140 = arith.constant 3.200000e+01 : f32
    %359 = vector.broadcast %cst_140 : f32 to vector<8x1xf32>
    %360 = arith.divf %358, %359 : vector<8x1xf32>
    %361 = vector.broadcast %353 : vector<8x1xf32> to vector<8x32xf32>
    %362 = arith.subf %345, %361 : vector<8x32xf32>
    %cst_141 = arith.constant 9.99999974E-6 : f32
    %363 = vector.broadcast %cst_141 : f32 to vector<8x1xf32>
    %364 = arith.addf %360, %363 : vector<8x1xf32>
    %365 = math.rsqrt %364 : vector<8x1xf32>
    %366 = vector.broadcast %365 : vector<8x1xf32> to vector<8x32xf32>
    %367 = arith.mulf %362, %366 : vector<8x32xf32>
    %368 = vector.broadcast %347 : vector<1x32xf32> to vector<8x32xf32>
    %369 = arith.mulf %367, %368 : vector<8x32xf32>
    %370 = vector.broadcast %349 : vector<1x32xf32> to vector<8x32xf32>
    %371 = arith.addf %369, %370 : vector<8x32xf32>
    %c1_142 = arith.constant 1 : index
    %c0_143 = arith.constant 0 : index
    %c0_144 = arith.constant 0 : index
    %372 = vector.load %arg9[%c1_142, %c0_143, %c0_144] : memref<2x32x32xf32, #tpu.memory_space<vmem>>, vector<1x32x32xf32>
    %373 = vector.shape_cast %372 : vector<1x32x32xf32> to vector<32x32xf32>
    %cst_145 = arith.constant dense<0.000000e+00> : vector<8x32xf32>
    %374 = tpu.matmul %371, %373, %cst_145 {dimension_numbers = #tpu.dot_dimension_numbers<[1], [0], [0], [1], [0, 0, 1, 1], [], []>} : vector<8x32xf32>, vector<32x32xf32>, vector<8x32xf32> -> vector<8x32xf32>
    %c1_146 = arith.constant 1 : index
    %c0_147 = arith.constant 0 : index
    %c0_148 = arith.constant 0 : index
    %375 = vector.load %arg10[%c1_146, %c0_147, %c0_148] : memref<2x1x32xf32, #tpu.memory_space<vmem>>, vector<1x1x32xf32>
    %376 = vector.shape_cast %375 : vector<1x1x32xf32> to vector<1x32xf32>
    %377 = vector.broadcast %376 : vector<1x32xf32> to vector<8x32xf32>
    %378 = arith.addf %374, %377 : vector<8x32xf32>
    %cst_149 = arith.constant 0.000000e+00 : f32
    %379 = vector.broadcast %cst_149 : f32 to vector<8x32xf32>
    %380 = arith.maximumf %378, %379 : vector<8x32xf32>
    %c1_150 = arith.constant 1 : index
    %c0_151 = arith.constant 0 : index
    %c0_152 = arith.constant 0 : index
    %381 = vector.load %arg11[%c1_150, %c0_151, %c0_152] : memref<2x32x32xf32, #tpu.memory_space<vmem>>, vector<1x32x32xf32>
    %382 = vector.shape_cast %381 : vector<1x32x32xf32> to vector<32x32xf32>
    %cst_153 = arith.constant dense<0.000000e+00> : vector<8x32xf32>
    %383 = tpu.matmul %380, %382, %cst_153 {dimension_numbers = #tpu.dot_dimension_numbers<[1], [0], [0], [1], [0, 0, 1, 1], [], []>} : vector<8x32xf32>, vector<32x32xf32>, vector<8x32xf32> -> vector<8x32xf32>
    %c1_154 = arith.constant 1 : index
    %c0_155 = arith.constant 0 : index
    %c0_156 = arith.constant 0 : index
    %384 = vector.load %arg12[%c1_154, %c0_155, %c0_156] : memref<2x1x32xf32, #tpu.memory_space<vmem>>, vector<1x1x32xf32>
    %385 = vector.shape_cast %384 : vector<1x1x32xf32> to vector<1x32xf32>
    %386 = vector.broadcast %385 : vector<1x32xf32> to vector<8x32xf32>
    %387 = arith.addf %383, %386 : vector<8x32xf32>
    %388 = arith.addf %387, %371 : vector<8x32xf32>
    %c1_157 = arith.constant 1 : index
    %c0_158 = arith.constant 0 : index
    %c0_159 = arith.constant 0 : index
    %389 = vector.load %arg13[%c1_157, %c0_158, %c0_159] : memref<2x1x32xf32, #tpu.memory_space<vmem>>, vector<1x1x32xf32>
    %390 = vector.shape_cast %389 : vector<1x1x32xf32> to vector<1x32xf32>
    %c1_160 = arith.constant 1 : index
    %c0_161 = arith.constant 0 : index
    %c0_162 = arith.constant 0 : index
    %391 = vector.load %arg14[%c1_160, %c0_161, %c0_162] : memref<2x1x32xf32, #tpu.memory_space<vmem>>, vector<1x1x32xf32>
    %392 = vector.shape_cast %391 : vector<1x1x32xf32> to vector<1x32xf32>
    %cst_163 = arith.constant dense<0.000000e+00> : vector<8xf32>
    %393 = vector.multi_reduction <add>, %388, %cst_163 [1] : vector<8x32xf32> to vector<8xf32>
    %394 = vector.shape_cast %393 : vector<8xf32> to vector<8x1xf32>
    %cst_164 = arith.constant 3.200000e+01 : f32
    %395 = vector.broadcast %cst_164 : f32 to vector<8x1xf32>
    %396 = arith.divf %394, %395 : vector<8x1xf32>
    %397 = vector.broadcast %396 : vector<8x1xf32> to vector<8x32xf32>
    %398 = arith.subf %388, %397 : vector<8x32xf32>
    %399 = arith.mulf %398, %398 : vector<8x32xf32>
    %cst_165 = arith.constant dense<0.000000e+00> : vector<8xf32>
    %400 = vector.multi_reduction <add>, %399, %cst_165 [1] : vector<8x32xf32> to vector<8xf32>
    %401 = vector.shape_cast %400 : vector<8xf32> to vector<8x1xf32>
    %cst_166 = arith.constant 3.200000e+01 : f32
    %402 = vector.broadcast %cst_166 : f32 to vector<8x1xf32>
    %403 = arith.divf %401, %402 : vector<8x1xf32>
    %404 = vector.broadcast %396 : vector<8x1xf32> to vector<8x32xf32>
    %405 = arith.subf %388, %404 : vector<8x32xf32>
    %cst_167 = arith.constant 9.99999974E-6 : f32
    %406 = vector.broadcast %cst_167 : f32 to vector<8x1xf32>
    %407 = arith.addf %403, %406 : vector<8x1xf32>
    %408 = math.rsqrt %407 : vector<8x1xf32>
    %409 = vector.broadcast %408 : vector<8x1xf32> to vector<8x32xf32>
    %410 = arith.mulf %405, %409 : vector<8x32xf32>
    %411 = vector.broadcast %390 : vector<1x32xf32> to vector<8x32xf32>
    %412 = arith.mulf %410, %411 : vector<8x32xf32>
    %413 = vector.broadcast %392 : vector<1x32xf32> to vector<8x32xf32>
    %414 = arith.addf %412, %413 : vector<8x32xf32>
    %415 = vector.shape_cast %414 : vector<8x32xf32> to vector<1x8x32xf32>
    %c0_168 = arith.constant 0 : index
    %c0_169 = arith.constant 0 : index
    %c0_170 = arith.constant 0 : index
    %416 = vector.load %arg15[%c0_168, %c0_169, %c0_170] : memref<1x8x32xf32, #tpu.memory_space<vmem>>, vector<1x8x32xf32>
    tpu.vector_store %arg15[%c0_168, %c0_169, %c0_170], %415 {strides = array<i32>} : memref<1x8x32xf32, #tpu.memory_space<vmem>>, vector<1x8x32xf32>,
    return
  }
  func.func @transform_0(%arg0: i32) -> (i32, i32, i32) {
    %c0_i32 = arith.constant 0 : i32
    %c0_i32_0 = arith.constant 0 : i32
    %c0_i32_1 = arith.constant 0 : i32
    return %arg0, %c0_i32, %c0_i32_0 : i32, i32, i32
  }
  func.func @transform_1(%arg0: i32) -> (i32, i32) {
    %c0_i32 = arith.constant 0 : i32
    %c0_i32_0 = arith.constant 0 : i32
    %c0_i32_1 = arith.constant 0 : i32
    return %c0_i32, %c0_i32_0 : i32, i32
  }
  func.func @transform_2(%arg0: i32) -> (i32, i32, i32) {
    %c0_i32 = arith.constant 0 : i32
    %c0_i32_0 = arith.constant 0 : i32
    %c0_i32_1 = arith.constant 0 : i32
    %c0_i32_2 = arith.constant 0 : i32
    return %c0_i32, %c0_i32_0, %c0_i32_1 : i32, i32, i32
  }
  func.func @transform_3(%arg0: i32) -> (i32, i32, i32) {
    %c0_i32 = arith.constant 0 : i32
    %c0_i32_0 = arith.constant 0 : i32
    %c0_i32_1 = arith.constant 0 : i32
    %c0_i32_2 = arith.constant 0 : i32
    return %c0_i32, %c0_i32_0, %c0_i32_1 : i32, i32, i32
  }
  func.func @transform_4(%arg0: i32) -> (i32, i32, i32) {
    %c0_i32 = arith.constant 0 : i32
    %c0_i32_0 = arith.constant 0 : i32
    %c0_i32_1 = arith.constant 0 : i32
    %c0_i32_2 = arith.constant 0 : i32
    return %c0_i32, %c0_i32_0, %c0_i32_1 : i32, i32, i32
  }
  func.func @transform_5(%arg0: i32) -> (i32, i32, i32) {
    %c0_i32 = arith.constant 0 : i32
    %c0_i32_0 = arith.constant 0 : i32
    %c0_i32_1 = arith.constant 0 : i32
    %c0_i32_2 = arith.constant 0 : i32
    return %c0_i32, %c0_i32_0, %c0_i32_1 : i32, i32, i32
  }
  func.func @transform_6(%arg0: i32) -> (i32, i32, i32) {
    %c0_i32 = arith.constant 0 : i32
    %c0_i32_0 = arith.constant 0 : i32
    %c0_i32_1 = arith.constant 0 : i32
    %c0_i32_2 = arith.constant 0 : i32
    return %c0_i32, %c0_i32_0, %c0_i32_1 : i32, i32, i32
  }
  func.func @transform_7(%arg0: i32) -> (i32, i32, i32) {
    %c0_i32 = arith.constant 0 : i32
    %c0_i32_0 = arith.constant 0 : i32
    %c0_i32_1 = arith.constant 0 : i32
    %c0_i32_2 = arith.constant 0 : i32
    return %c0_i32, %c0_i32_0, %c0_i32_1 : i32, i32, i32
  }
  func.func @transform_8(%arg0: i32) -> (i32, i32, i32) {
    %c0_i32 = arith.constant 0 : i32
    %c0_i32_0 = arith.constant 0 : i32
    %c0_i32_1 = arith.constant 0 : i32
    %c0_i32_2 = arith.constant 0 : i32
    return %c0_i32, %c0_i32_0, %c0_i32_1 : i32, i32, i32
  }
  func.func @transform_9(%arg0: i32) -> (i32, i32, i32) {
    %c0_i32 = arith.constant 0 : i32
    %c0_i32_0 = arith.constant 0 : i32
    %c0_i32_1 = arith.constant 0 : i32
    %c0_i32_2 = arith.constant 0 : i32
    return %c0_i32, %c0_i32_0, %c0_i32_1 : i32, i32, i32
  }
  func.func @transform_10(%arg0: i32) -> (i32, i32, i32) {
    %c0_i32 = arith.constant 0 : i32
    %c0_i32_0 = arith.constant 0 : i32
    %c0_i32_1 = arith.constant 0 : i32
    %c0_i32_2 = arith.constant 0 : i32
    return %c0_i32, %c0_i32_0, %c0_i32_1 : i32, i32, i32
  }
  func.func @transform_11(%arg0: i32) -> (i32, i32, i32) {
    %c0_i32 = arith.constant 0 : i32
    %c0_i32_0 = arith.constant 0 : i32
    %c0_i32_1 = arith.constant 0 : i32
    %c0_i32_2 = arith.constant 0 : i32
    return %c0_i32, %c0_i32_0, %c0_i32_1 : i32, i32, i32
  }
  func.func @transform_12(%arg0: i32) -> (i32, i32, i32) {
    %c0_i32 = arith.constant 0 : i32
    %c0_i32_0 = arith.constant 0 : i32
    %c0_i32_1 = arith.constant 0 : i32
    %c0_i32_2 = arith.constant 0 : i32
    return %c0_i32, %c0_i32_0, %c0_i32_1 : i32, i32, i32
  }
  func.func @transform_13(%arg0: i32) -> (i32, i32, i32) {
    %c0_i32 = arith.constant 0 : i32
    %c0_i32_0 = arith.constant 0 : i32
    %c0_i32_1 = arith.constant 0 : i32
    %c0_i32_2 = arith.constant 0 : i32
    return %c0_i32, %c0_i32_0, %c0_i32_1 : i32, i32, i32
  }
  func.func @transform_14(%arg0: i32) -> (i32, i32, i32) {
    %c0_i32 = arith.constant 0 : i32
    %c0_i32_0 = arith.constant 0 : i32
    %c0_i32_1 = arith.constant 0 : i32
    return %arg0, %c0_i32, %c0_i32_0 : i32, i32, i32
  }
}

</mosaic_0001>

<bundles_post_ra>
// kernel: tpu_custom_call.1
= control target key start
LH: loop header
LB: loop body
LE: loop exit
PB: predicated region body
PF: predicated region fallthrough
CT: control target
= control target key end

     0   :  { %s6051_s0 = inlined_call_operand.hbm [shape: f32[2,8,32], index: 0, kind: input, shape index: {}]   ;;  %s6052_s1 = inlined_call_operand.hbm [shape: f32[8,32], index: 1, kind: input, shape index: {}]   ;;  %s6053_s2 = inlined_call_operand.hbm [shape: f32[2,32,96], index: 2, kind: input, shape index: {}]   ;;  %s6054_s3 = inlined_call_operand.vmem [shape: f32[2,1,96], index: 3, kind: input, shape index: {}]   ;;  %s6055_s4 = inlined_call_operand.hbm [shape: f32[2,32,32], index: 4, kind: input, shape index: {}]   ;;  %s6056_s5 = inlined_call_operand.vmem [shape: f32[2,1,32], index: 5, kind: input, shape index: {}]   ;;  %s6057_s6 = inlined_call_operand.vmem [shape: f32[2,1,32], index: 6, kind: input, shape index: {}]   ;;  %s6058_s7 = inlined_call_operand.vmem [shape: f32[2,1,32], index: 7, kind: input, shape index: {}]   ;;  %s6059_s8 = inlined_call_operand.hbm [shape: f32[2,32,32], index: 8, kind: input, shape index: {}]   ;;  %s6060_s9 = inlined_call_operand.vmem [shape: f32[2,1,32], index: 9, kind: input, shape index: {}]   ;;  %s6061_s10 = inlined_call_operand.hbm [shape: f32[2,32,32], index: 10, kind: input, shape index: {}]   ;;  %s6062_s11 = inlined_call_operand.vmem [shape: f32[2,1,32], index: 11, kind: input, shape index: {}]   ;;  %s6063_s12 = inlined_call_operand.vmem [shape: f32[2,1,32], index: 12, kind: input, shape index: {}]   ;;  %s6064_s13 = inlined_call_operand.vmem [shape: f32[2,1,32], index: 13, kind: input, shape index: {}]   ;;  %s6065_s14 = inlined_call_operand.hbm [shape: f32[2,8,32], index: 14, kind: output, shape index: {}]  }
   0x1   :  { %6102 = sst [smem:[#allocation19_spill]] %s6051_s0 }
   0x2   :  { %6103 = sst [smem:[#allocation20_spill]] %s6052_s1 }
   0x3   :  { %6104 = sst [smem:[#allocation21_spill]] %s6053_s2 }
   0x4   :  { %6105 = sst [smem:[#allocation22_spill]] %s6054_s3 }
   0x5   :  { %6106 = sst [smem:[#allocation23_spill]] %s6055_s4 }
   0x6   :  { %6107 = sst [smem:[#allocation24_spill]] %s6060_s9 }
   0x7   :  { %6108 = sst [smem:[#allocation25_spill]] %s6062_s11 }
   0x8   :  { %6109 = sst [smem:[#allocation26_spill]] %s6063_s12 }
   0x9   :  { %6110 = sst [smem:[#allocation27_spill]] %s6064_s13 }
   0xa   :  { %6111 = sst [smem:[#allocation28_spill]] %s6065_s14 }
   0xb   :  { %19 = vsyncpa [#allocation3], 0 }
   0xc   :  { %21 = vsyncpa [#allocation3 + $0x1], 0 }
   0xd   :  { %22 = vsyncpa [#allocation6], 0 }
   0xe   :  { %23 = vsyncpa [#allocation9], 0 }
   0xf   :  { %24 = vsyncpa [#allocation12], 0 }
  0x10   :  { %25 = vsyncpa [#allocation4], 0 }
  0x11   :  { %27 = vsyncpa [#allocation4 + $0x1], 0  ;;  %s5286_s29 = smov 0   ;;  %s5288_s30 = smov 0  }
  0x12   :  { %s5290_s15 = smov 0   ;;  %s5292_s16 = smov 0  }
  0x13 LB: > { %s5169_s17 = smov [#allocation5]   ;;  %s5307_s19 = sadd.s32 4294967295, %s5167_s16   ;;  %s5167_s16 = sphi %s5292_s16, %s6171_s16   ;;  %s5163_s15 = sphi %s5290_s15, %s6170_s15   ;;  %s5159_s30 = sphi %s5288_s30, %s6169_s30   ;;  %s5155_s29 = sphi %s5286_s29, %s6168_s29  }
  0x14   : > { %s376_s18 = sshll.u32 %s5169_s17, 4  ;;  %p4214_p0 = scmp.ge.s32.totalorder %s5167_s16, 1  ;;  %s377_s18 = int_to_ptr.vmem [resolvable:$true] %s376_s18 }
  0x15   : > { %p6068_p1 = scmp.eq.s32.totalorder %s5307_s19, 0  ;;  %p363_p2 = scmp.lt.s32.totalorder %s5167_s16, 3 }
  0x16   : > { %s5170_s21 = smov [#allocation8]   ;;  %s5171_s24 = smov [#allocation7]  }
  0x17   : > { %p5312_p3 = pnand %p4214_p0, %p363_p2  ;;  %s402_s22 = sshll.u32 %s5170_s21, 4  ;;  %s5325_s22 = int_to_ptr.vmem [resolvable:$true] %s402_s22 }
  0x18   : > { %s386_s25 = sshll.u32 %s5171_s24, 4  ;;  %s6114_s1 = sld [smem:[#allocation20_spill]]  ;;  %s5327_s25 = int_to_ptr.vmem [resolvable:$true] %s386_s25 }
  0x19   : > { %s6112_s20 = scalar_select %p5312_p3, 1, 0 }
  0x1a   : > { %p4739_p5 = pneg %p5312_p3 }
  0x1c   : > { %p5321_p6 = pnand %p4739_p5, %p6068_p1 }
  0x1e   : > { %s4919_s28 = scalar_lea.hbm %s6114_s1, 128  ;;  %p5337_p8 = pneg %p5321_p6 }
  0x1f   : > { %p4920_p7 = scmp.ne.s32.totalorder %s6114_s1, %s4919_s28  ;;  %p4926_p11 = scmp.lt.u32.totalorder %s4919_s28, %s6114_s1 }
  0x21   : > { %p4922_p9 = pnand %p5337_p8, %p4920_p7 }
  0x23   : > { %p4923_p10 = pneg %p4922_p9 }
  0x25   : > { %p4928_p12 = pnand %p4926_p11, %p4923_p10 }
  0x27   : > { %4931 = shalt.err (!%p4928_p12)
}
  0x28   : > { %s4932_s26 = scalar_lea.vmem %s377_s18, 128  ;;  %p4940_p5 = scmp.lt.s32.totalorder %s377_s18, %s377_s18 }
  0x29   : > { %p4933_p13 = scmp.ne.s32.totalorder %s377_s18, %s4932_s26  ;;  %p4941_p4 = scmp.lt.s32.totalorder %s4932_s26, %s4932_s26 }
  0x2b   : > { %p4935_p0 = pnand %p4933_p13, %p5337_p8  ;;  %p4942_p1 = por %p4941_p4, %p4940_p5 }
  0x2d   : > { %p4936_p2 = pneg %p4935_p0 }
  0x2f   : > { %p4943_p3 = pnand %p4942_p1, %p4936_p2 }
  0x31   : > { %4946 = shalt.err (!%p4943_p3)
}
  0x32   : > { %4742 = dma.hbm_to_vmem [thread:$0]  (!%p5321_p6), %s6114_s1, 128, %s377_s18, [#allocation6]  }
  0x33   : > { %s6116_s4 = sld [smem:[#allocation23_spill]] }
  0x39   : > { %s4947_s17 = scalar_lea.hbm %s6116_s4, 1024 }
  0x3a   : > { %p4948_p7 = scmp.ne.s32.totalorder %s6116_s4, %s4947_s17  ;;  %p4954_p1 = scmp.lt.u32.totalorder %s4947_s17, %s6116_s4 }
  0x3c   : > { %p4950_p9 = pnand %p4948_p7, %p5337_p8 }
  0x3e   : > { %p4951_p4 = pneg %p4950_p9 }
  0x40   : > { %p4956_p3 = pnand %p4954_p1, %p4951_p4 }
  0x42   : > { %4959 = shalt.err (!%p4956_p3)
}
  0x43   : > { %s4960_s18 = scalar_lea.vmem %s5325_s22, 1024  ;;  %p4968_p13 = scmp.lt.s32.totalorder %s5325_s22, %s5325_s22 }
  0x44   : > { %p4961_p10 = scmp.ne.s32.totalorder %s5325_s22, %s4960_s18  ;;  %p4969_p0 = scmp.lt.s32.totalorder %s4960_s18, %s4960_s18 }
  0x46   : > { %p4963_p11 = pnand %p4961_p10, %p5337_p8  ;;  %p4970_p2 = por %p4969_p0, %p4968_p13 }
  0x48   : > { %p4964_p12 = pneg %p4963_p11 }
  0x4a   : > { %p4971_p5 = pnand %p4970_p2, %p4964_p12 }
  0x4c   : > { %4974 = shalt.err (!%p4971_p5)
}
  0x4d   : > { %s5172_s12 = smov 128   ;;  %s5173_s11 = smov 8  }
  0x4e   : > { %4748 = dma.hbm_to_vmem [thread:$0]  (!%p5321_p6), %s6116_s4, 1024, %s5325_s22, [#allocation9], %s5172_s12, %s5172_s12, %s5173_s11  }
  0x4f   : > { %s6117_s2 = sld [smem:[#allocation21_spill]] }
  0x55   : > { %s4975_s17 = scalar_lea.hbm %s6117_s2, 1024 }
  0x56   : > { %p4976_p7 = scmp.ne.s32.totalorder %s6117_s2, %s4975_s17  ;;  %p4982_p1 = scmp.lt.u32.totalorder %s4975_s17, %s6117_s2 }
  0x58   : > { %p4978_p9 = pnand %p4976_p7, %p5337_p8 }
  0x5a   : > { %p4979_p4 = pneg %p4978_p9 }
  0x5c   : > { %p4984_p3 = pnand %p4982_p1, %p4979_p4 }
  0x5e   : > { %4987 = shalt.err (!%p4984_p3)
}
  0x5f   : > { %s4988_s22 = scalar_lea.vmem %s5327_s25, 1024  ;;  %p4996_p13 = scmp.lt.s32.totalorder %s5327_s25, %s5327_s25 }
  0x60   : > { %p4989_p10 = scmp.ne.s32.totalorder %s5327_s25, %s4988_s22  ;;  %p4997_p0 = scmp.lt.s32.totalorder %s4988_s22, %s4988_s22 }
  0x62   : > { %p4991_p11 = pnand %p4989_p10, %p5337_p8  ;;  %p4998_p2 = por %p4997_p0, %p4996_p13 }
  0x64   : > { %p4992_p12 = pneg %p4991_p11 }
  0x66   : > { %p4999_p5 = pnand %p4998_p2, %p4992_p12 }
  0x68   : > { %5002 = shalt.err (!%p4999_p5)
}
  0x69   : > { %4745 = dma.hbm_to_vmem [thread:$0]  (!%p5321_p6), %s6117_s2, 1024, %s5327_s25, [#allocation6], %s5172_s12, %s5172_s12, %s5173_s11  }
  0x6a   : > { %s5174_s27 = smov [#allocation10]   ;;  %s5175_s28 = smov [#allocation11]  }
  0x6b   : > { %s424_s13 = sshll.u32 %s5174_s27, 4  ;;  %s440_s17 = sshll.u32 %s5175_s28, 4  ;;  %s425_s13 = int_to_ptr.vmem [resolvable:$true] %s424_s13  ;;  %s441_s17 = int_to_ptr.vmem [resolvable:$true] %s440_s17 }
  0x6c   : > { %s5003_s18 = scalar_lea.hbm %s6059_s8, 1024 }
  0x6d   : > { %p5004_p7 = scmp.ne.s32.totalorder %s6059_s8, %s5003_s18  ;;  %p5010_p1 = scmp.lt.u32.totalorder %s5003_s18, %s6059_s8 }
  0x6f   : > { %p5006_p9 = pnand %p5004_p7, %p5337_p8 }
  0x71   : > { %p5007_p4 = pneg %p5006_p9 }
  0x73   : > { %p5012_p3 = pnand %p5010_p1, %p5007_p4 }
  0x75   : > { %5015 = shalt.err (!%p5012_p3)
}
  0x76   : > { %s5016_s25 = scalar_lea.vmem %s425_s13, 1024  ;;  %p5024_p13 = scmp.lt.s32.totalorder %s425_s13, %s425_s13 }
  0x77   : > { %p5017_p10 = scmp.ne.s32.totalorder %s425_s13, %s5016_s25  ;;  %p5025_p0 = scmp.lt.s32.totalorder %s5016_s25, %s5016_s25 }
  0x79   : > { %p5019_p11 = pnand %p5017_p10, %p5337_p8  ;;  %p5026_p2 = por %p5025_p0, %p5024_p13 }
  0x7b   : > { %p5020_p12 = pneg %p5019_p11 }
  0x7d   : > { %p5027_p5 = pnand %p5026_p2, %p5020_p12 }
  0x7f   : > { %5030 = shalt.err (!%p5027_p5)
}
  0x80   : > { %4751 = dma.hbm_to_vmem [thread:$0]  (!%p5321_p6), %s6059_s8, 1024, %s425_s13, [#allocation9], %s5172_s12, %s5172_s12, %s5173_s11  }
  0x81   : > { %s5031_s28 = scalar_lea.hbm %s6061_s10, 1024 }
  0x82   : > { %p5032_p7 = scmp.ne.s32.totalorder %s6061_s10, %s5031_s28  ;;  %p5038_p1 = scmp.lt.u32.totalorder %s5031_s28, %s6061_s10 }
  0x84   : > { %p5034_p9 = pnand %p5032_p7, %p5337_p8 }
  0x86   : > { %p5035_p4 = pneg %p5034_p9 }
  0x88   : > { %p5040_p3 = pnand %p5038_p1, %p5035_p4 }
  0x8a   : > { %5043 = shalt.err (!%p5040_p3)
}
  0x8b   : > { %s5044_s1 = scalar_lea.vmem %s441_s17, 1024  ;;  %p5052_p13 = scmp.lt.s32.totalorder %s441_s17, %s441_s17 }
  0x8c   : > { %p5045_p10 = scmp.ne.s32.totalorder %s441_s17, %s5044_s1  ;;  %p5053_p0 = scmp.lt.s32.totalorder %s5044_s1, %s5044_s1 }
  0x8e   : > { %p5047_p11 = pnand %p5045_p10, %p5337_p8  ;;  %p5054_p2 = por %p5053_p0, %p5052_p13 }
  0x90   : > { %p5048_p12 = pneg %p5047_p11 }
  0x92   : > { %p5055_p5 = pnand %p5054_p2, %p5048_p12 }
  0x94   : > { %5058 = shalt.err (!%p5055_p5)
}
  0x95   : > { %4754 = dma.hbm_to_vmem [thread:$0]  (!%p5321_p6), %s6061_s10, 1024, %s441_s17, [#allocation12], %s5172_s12, %s5172_s12, %s5173_s11  }
  0x96   : > { %s4213_s23 = sadd.s32 4294967294, %s5167_s16   ;;  %s5449_s21 = sadd.s32 1, %s5167_s16  }
  0x97   : > { %s40_s4 = sadd.s32 1, %s5163_s15  ;;  %s37_s9 = ssub.s32 %s5167_s16, %s5449_s21 }
  0x98   : > { %p47_p8 = scmp.ne.s32.totalorder %s5163_s15, %s5159_s30  ;;  %p38_p7 = scmp.eq.s32.totalorder %s37_s9, 0 }
  0x99   : > { %p48_p9 = scmp.eq.s32.totalorder %s5167_s16, 0  ;;  %p53_p4 = scmp.ne.s32.totalorder %s5159_s30, %s5155_s29 }
  0x9a   : > { %p350_p1 = scmp.eq.s32.totalorder %s5307_s19, 1  ;;  %p6118_p10 = scmp.eq.s32.totalorder %s5307_s19, 0 }
  0x9b   : > { %s5461_s14 = scalar_select %p38_p7, %s5163_s15, %s40_s4  }
  0x9c   : > { %p49_p3 = por %p48_p9, %p47_p8  ;;  %p5465_p11 = por %p6118_p10, %p53_p4 }
  0x9d   : > { %p5469_p6 = por %p350_p1, %p47_p8  ;;  %p356_p12 = scmp.eq.s32.totalorder %s4213_s23, 1 }
  0x9e   : > { %p4768_p13 = scmp.lt.s32.totalorder %s5167_s16, 2  ;;  %s463_s11 = sand.u32 1, %s5163_s15  }
  0x9f   : > { %s6120_s12 = scalar_select %p5469_p6, 1, 0 }
  0xa0   : > { %p5475_p0 = por %p356_p12, %p53_p4  ;;  %s4221_s28 = sshll.u32 %s463_s11, 3 }
  0xa1   : > { %s4222_s24 = sshll.u32 %s5167_s16, 7  ;;  %s6122_s0 = sld [smem:[#allocation19_spill]] }
  0xa2   : > { %s6121_s17 = scalar_select %p5475_p0, 1, 0 }
  0xa3   : > { %s467_s1 = scalar_lea.vmem [#allocation2], %s4221_s28  ;;  %p5485_p2 = pnand %p4768_p13, %p49_p3 }
  0xa4   : > { %s474_s13 = sshll.u32 %s467_s1, 4  ;;  %s464_s23 = scalar_lea.sflag [#allocation3], %s463_s11  ;;  %s5489_s13 = int_to_ptr.vmem [resolvable:$true] %s474_s13 }
  0xa5   : > { %p5061_p8 = pneg %p5485_p2 }
  0xa7   : > { %s5483_s22 = scalar_lea.hbm %s6122_s0, %s4222_s24  ;;  %s5064_s24 = scalar_lea.hbm %s6122_s0, 256 }
  0xa8   : > { %s5059_s4 = scalar_lea.hbm %s5483_s22, 128  ;;  %p5065_p4 = scmp.lt.u32.totalorder %s5483_s22, %s6122_s0 }
  0xa9   : > { %p5060_p5 = scmp.ne.s32.totalorder %s5483_s22, %s5059_s4  ;;  %p5066_p1 = scmp.lt.u32.totalorder %s5064_s24, %s5059_s4 }
  0xaa   : > { %p5068_p10 = scmp.lt.u32.totalorder %s5059_s4, %s5483_s22 }
  0xab   : > { %p5062_p7 = pnand %p5061_p8, %p5060_p5  ;;  %p5067_p3 = por %p5066_p1, %p5065_p4 }
  0xad   : > { %p5063_p9 = pneg %p5062_p7  ;;  %p5069_p12 = por %p5068_p10, %p5067_p3 }
  0xaf   : > { %p5070_p13 = pnand %p5069_p12, %p5063_p9 }
  0xb1   : > { %5073 = shalt.err (!%p5070_p13)
}
  0xb2   : > { %s5074_s11 = scalar_lea.vmem %s5489_s13, 128  ;;  %s5176_s1 = smov [#allocation2]  }
  0xb3   : > { %p5075_p5 = scmp.ne.s32.totalorder %s5489_s13, %s5074_s11  ;;  %s5079_s9 = sshll.u32 %s5176_s1, 4  ;;  %s5080_s9 = int_to_ptr.vmem [resolvable:$false] %s5079_s9 }
  0xb4   : > { %s5081_s28 = scalar_lea.vmem %s5080_s9, 256  ;;  %p5082_p6 = scmp.lt.s32.totalorder %s5489_s13, %s5080_s9 }
  0xb5   : > { %p5077_p7 = pnand %p5075_p5, %p5061_p8  ;;  %p5083_p4 = scmp.lt.s32.totalorder %s5081_s28, %s5074_s11 }
  0xb7   : > { %p5078_p0 = pneg %p5077_p7  ;;  %p5084_p1 = por %p5083_p4, %p5082_p6 }
  0xb9   : > { %p5085_p3 = pnand %p5084_p1, %p5078_p0 }
  0xbb   : > { %5088 = shalt.err (!%p5085_p3)
}
  0xbc   : > { %4758 = dma.hbm_to_vmem [thread:$0]  (!%p5485_p2), %s5483_s22, 128, %s5489_s13, %s464_s23  }
  0xbd   : > { %p6124_p9 = scmp.ne.s32.totalorder %s6112_s20, 0 }
  0xbe   : > { %s5519_s4 = sand.u32 (!%p6124_p9), 1, %s5159_s30  }
  0xbf   : > { %483 = sbr.rel (%p6124_p9) target bundleno = 5797 (0x16a5), region = 76  ;;  %s6074_s24 = sshll.u32 (!%p6124_p9), %s5519_s4, 3 }
  0xc0   : > { %s486_s26 = scalar_lea.sflag (!%p6124_p9), [#allocation3], %s5519_s4  ;;  %s489_s18 = scalar_lea.vmem (!%p6124_p9), [#allocation2], %s6074_s24 }
  0xc6   : > { %5134 = dma.done.wait (%p5465_p11), %s486_s26, 128  }
  0xc7   : > { %5136 = vsyncadd (%p5465_p11), %s486_s26, 4294967168  ;;  %p6125_p6 = scmp.eq.s32.totalorder %s5307_s19, 0 }
  0xc9   : > { %5138 = dma.done.wait (%p6125_p6), [#allocation6], 1152   ;;  %p6126_p0 = pmov %p6125_p6 }
  0xcb   : > { %5140 = vsyncadd (%p6126_p0), [#allocation6], 4294966144  ;;  %p6127_p2 = pmov %p6126_p0 }
  0xcc   : > { %p6128_p8 = pmov %p6126_p0 }
  0xcd   : > { %5142 = dma.done.wait (%p6127_p2), [#allocation9], 2048  }
  0xce   : > { %5144 = vsyncadd (%p6128_p8), [#allocation9], 4294965248  ;;  %p6129_p10 = pmov %p6126_p0 }
  0xcf   : > { %p6130_p12 = pmov %p6126_p0 }
  0xd0   : > { %5146 = dma.done.wait (%p6129_p10), [#allocation12], 1024  }
  0xd1   : > { %5148 = vsyncadd (%p6130_p12), [#allocation12], 4294966272  ;;  %v5177_v0 = vmov 0.0|0.0   ;;  %vm5178_vm0 = vmmov 0   ;;  %v5179_v1 = vmov 0.0   ;;  %v557_v2 = vld [vmem:[#allocation7] sm:$0xff] }
  0xd2   : > { %4667 = vmatprep.subr.bf16.mxu0 %v5177_v0  ;;  %4427 = vmatprep.mubr.msk.f32.mxu0 %vm5178_vm0, %v5179_v1  ;;  %v558_v3 = vld [vmem:[#allocation7 + $0x8] sm:$0xff]  ;;  %v559_v4 = vld [vmem:[#allocation7 + $0x10] sm:$0xff]  ;;  %v560_v6 = vld [vmem:[#allocation7 + $0x18] sm:$0xff]  ;;  %vm568_vm1 = vcmask 261120   ;;  %s6131_s3 = sld [smem:[#allocation22_spill]]  ;;  %s6075_s22 = smov 64  }
  0xd3   : > { %4430 = vmatprep.subr.mxu1 %v5179_v1  ;;  %4432 = vmatprep.mubr.msk.f32.mxu1 %vm5178_vm0, %v5179_v1  ;;  %v4668_v5 = vpack.c.bf16 %v558_v3, %v557_v2  ;;  %v4671_v7 = vpack.c.bf16 %v560_v6, %v559_v4  ;;  %v554_v8 = vld [vmem:[%s489_s18] sm:$0xff]  ;;  %v555_v9 = vld [vmem:[#allocation5] sm:$0xff]  ;;  %s5181_s13 = smov 96   ;;  %s5182_s25 = smov 92   ;;  %vm645_vm2 = vcmask 31744   ;;  %vm720_vm3 = vcmask 64512  }
  0xd4   : > { %v5548_v10 = vadd.f32 %v555_v9, %v554_v8  ;;  %s6101_s23 = smov 124   ;;  %s6099_s11 = smov 88   ;;  %vm1993_vm4 = vcmask 97280   ;;  %vm1995_vm5 = vcmask 130048   ;;  %vm1997_vm6 = vcmask 162816  }
  0xd5   : > { %4669 = vmatpush3.bf16.msra.mxu0 %v4668_v5  ;;  %s5185_s1 = smov 120   ;;  %s6100_s9 = smov 116   ;;  %vm1999_vm7 = vcmask 195584   ;;  %vm2001_vm8 = vcmask 228352  }
  0xd6   : > { %4670 = vmatprep.subr.bf16.mxu0 %v5177_v0  ;;  %s6083_s28 = smov 84   ;;  %s6077_s26 = smov 72  }
  0xd7   : > { %s6076_s18 = smov 68   ;;  %s6081_s20 = smov 80  }
  0xd8   : > { %v4231_v11 = vld [vmem:[%s6131_s3] ss:$0 sm:$0xff]  ;;  %s6098_s27 = smov 112   ;;  %s6079_s24 = smov 76  }
  0xd9   : > { %4672 = vmatpush3.bf16.msra.mxu0 %v4671_v7  ;;  %s6164_s2 = sld [smem:[#allocation28_spill]]  ;;  %p6165_p13 = scmp.ne.s32.totalorder %s6120_s12, 0 }
  0xda   : > { %4450 = vmatprep.subr.mxu0 %v5179_v1 }
  0xdc   : > { %4428 = vmatmul.mubr.msk.f32.vlgmr.msra.gmra.mrb[0].mxu0 %vm568_vm1, %v5548_v10 }
  0xdd   : > { %4452 = vmatprep.mubr.msk.f32.mxu0 %vm5178_vm0, %v5179_v1 }
 0x1af   : > { %v638_v12 = vpop.f32.mrb[0].mxu0 }
 0x1b0   : > { %v5558_v13 = vadd.f32 %v4231_v11, %v638_v12  ;;  %v4429_v14 = vpop.f32.mrb[1].mxu0 }
 0x1b2   : > { %732 = vrot.lane.b32.xlu1 %v5558_v13, %s6075_s22  ;;  %643 = vrot.lane.b32.xlu0 %v5558_v13, %s5181_s13  ;;  %s6082_s22 = smov 108  }
 0x1b6   : > { %810 = vrot.lane.b32.xlu1 %v5558_v13, %s5182_s25 }
 0x1ba   : > { %808 = vrot.lane.b32.xlu1 %v5558_v13, %s6101_s23  ;;  %s6138_s23 = smov 88  }
 0x1be   : > { %975 = vrot.lane.b32.xlu1 %v5558_v13, %s6099_s11  ;;  %s6135_s11 = sld [smem:[#allocation27_spill]] }
 0x1c2   : > { %973 = vrot.lane.b32.xlu1 %v5558_v13, %s5185_s1 }
 0x1c6   : > { %1138 = vrot.lane.b32.xlu1 %v5558_v13, %s6100_s9  ;;  %s6139_s9 = smov 112  }
 0x224   : > { %v733_v15 = vpop.permute.xlu1 %732  ;;  %v644_v16 = vpop.permute.xlu0 %643 }
 0x225   : > { %4431 = vmatpush3.xpose.msk.msra.mxu1 %vm645_vm2, %v644_v16 }
 0x226   : > { %4435 = vmatprep.subr.mxu1 %v5179_v1 }
 0x228   : > { %v5576_v17 = vpop.permute.xlu1 %810  ;;  %4433 = vmatmul.mubr.msk.f32.vlgmr.msra.gmra.mrb[0].mxu1 %vm645_vm2, %v5558_v13 }
 0x229   : > { %4436 = vmatpush3.msra.mxu1 %v733_v15  ;;  %4437 = vmatprep.mubr.msk.f32.mxu1 %vm5178_vm0, %v5179_v1 }
 0x22a   : > { %4440 = vmatprep.subr.mxu1 %v5179_v1 }
 0x22c   : > { %v5583_v18 = vpop.permute.xlu1 %808 }
 0x230   : > { %v976_v19 = vpop.permute.xlu1 %975 }
 0x231   : > { %4451 = vmatpush3.xpose.msk.msra.mxu0 %vm645_vm2, %v976_v19 }
 0x232   : > { %4460 = vmatprep.subr.mxu0 %v5179_v1 }
 0x234   : > { %v974_v20 = vpop.permute.xlu1 %973 }
 0x235   : > { %4453 = vmatmul.mubr.msk.f32.vlgmr.msra.gmra.mrb[2].mxu0 %vm645_vm2, %v974_v20 }
 0x236   : > { %4462 = vmatprep.mubr.msk.f32.mxu0 %vm5178_vm0, %v5179_v1 }
 0x238   : > { %v1139_v30 = vpop.permute.xlu1 %1138 }
 0x2fb   : > { %v716_v21 = vpop.f32.mrb[0].mxu1 }
 0x2fc   : > { %v4434_v22 = vpop.f32.mrb[1].mxu1  ;;  %v721_v23 = vsel %vm720_vm3, %v716_v21, -inf }
 0x2fd   : > { %722 = vmax.xlane.f32.xlu0 %v721_v23 }
 0x308   : > { %v5591_v24 = vpop.f32.mrb[2].mxu0 }
 0x309   : > { %v4454_v25 = vpop.f32.mrb[3].mxu0  ;;  %v1051_v33 = vsel %vm720_vm3, %v5591_v24, -inf }
 0x313   : > { %1140 = vrot.lane.b32.xlu0 %v5558_v13, %s6083_s28  ;;  %s6087_s28 = smov 44  }
 0x317   : > { %1635 = vrot.lane.b32.xlu0 %v5558_v13, %s6077_s26  ;;  %s6078_s26 = smov 100  }
 0x31b   : > { %1800 = vrot.lane.b32.xlu0 %v5558_v13, %s6076_s18  ;;  %s6080_s18 = smov 104  }
 0x38a   : > { %v723_v26 = vpop.xlane.xlu0 %722 }
 0x38b   : > { %v724_v27 = vsub.f32 %v716_v21, %v723_v26 }
 0x38d   : > { %v725_v28 = vmul.f32 1.442695, %v724_v27 }
 0x38e   : > { %v1141_v29 = vpop.permute.xlu0 %1140 }
 0x38f   : > { %4847 = vpow2.f32 %v725_v28  ;;  %4461 = vmatpush3.xpose.msk.msra.mxu0 %vm645_vm2, %v1141_v29 }
 0x390   : > { %4470 = vmatprep.subr.mxu0 %v5179_v1 }
 0x392   : > { %4463 = vmatmul.mubr.msk.f32.vlgmr.msra.gmra.mrb[4].mxu0 %vm645_vm2, %v1139_v30  ;;  %v1636_v40 = vpop.permute.xlu0 %1635 }
 0x393   : > { %4472 = vmatprep.mubr.msk.f32.mxu0 %vm5178_vm0, %v5179_v1 }
 0x396   : > { %v1801_v43 = vpop.permute.xlu0 %1800 }
 0x399   : > { %v4848_v31 = vpop.eup %4847 }
 0x39a   : > { %v727_v32 = vsel %vm720_vm3, %v4848_v31, 0.0 }
 0x39b   : > { %728 = vadd.xlane.f32.xlu1 %v727_v32 }
 0x3ac   : > { %1305 = vrot.lane.b32.xlu1 %v5558_v13, %s6081_s20  ;;  %s6097_s20 = smov 56  }
 0x3b0   : > { %1303 = vrot.lane.b32.xlu1 %v5558_v13, %s6098_s27  ;;  %s6136_s27 = smov 124  }
 0x3b4   : > { %1470 = vrot.lane.b32.xlu1 %v5558_v13, %s6079_s24  ;;  %s6096_s24 = smov 52  }
 0x3b8   : > { %1468 = vrot.lane.b32.xlu1 %v5558_v13, %s6082_s22  ;;  %s6086_s22 = smov 40  }
 0x3bc   : > { %1633 = vrot.lane.b32.xlu1 %v5558_v13, %s6080_s18  ;;  %s6090_s18 = smov 48  }
 0x3c0   : > { %1798 = vrot.lane.b32.xlu1 %v5558_v13, %s6078_s26  ;;  %s6084_s26 = smov 60  }
 0x3e4   : > { %1052 = vmax.xlane.f32.xlu1 %v1051_v33 }
 0x428   : > { %v729_v34 = vpop.xlane.xlu1 %728 }
 0x429   : > { %4849 = vrcp.f32 %v729_v34 }
 0x42c   : > { %v1306_v35 = vpop.permute.xlu1 %1305 }
 0x42d   : > { %4471 = vmatpush3.xpose.msk.msra.mxu0 %vm645_vm2, %v1306_v35 }
 0x42e   : > { %4480 = vmatprep.subr.mxu0 %v5179_v1 }
 0x430   : > { %v1304_v36 = vpop.permute.xlu1 %1303 }
 0x431   : > { %4473 = vmatmul.mubr.msk.f32.vlgmr.msra.gmra.mrb[6].mxu0 %vm645_vm2, %v1304_v36 }
 0x432   : > { %4482 = vmatprep.mubr.msk.f32.mxu0 %vm5178_vm0, %v5179_v1 }
 0x433   : > { %v4850_v37 = vpop.eup %4849 }
 0x434   : > { %v731_v38 = vmul.f32 %v4850_v37, %v4848_v31  ;;  %v1471_v39 = vpop.permute.xlu1 %1470 }
 0x435   : > { %4481 = vmatpush3.xpose.msk.msra.mxu0 %vm645_vm2, %v1471_v39 }
 0x436   : > { %4438 = vmatmul.mubr.msk.f32.vlgmr.msra.gmra.mrb[2].mxu1 %vm720_vm3, %v731_v38  ;;  %4490 = vmatprep.subr.mxu0 %v5179_v1 }
 0x437   : > { %4441 = vmatpush3.xpose.msk.msra.mxu1 %vm645_vm2, %v5576_v17  ;;  %4442 = vmatprep.mubr.msk.f32.mxu1 %vm5178_vm0, %v5179_v1 }
 0x438   : > { %v1469_v41 = vpop.permute.xlu1 %1468  ;;  %4445 = vmatprep.subr.mxu1 %v5179_v1 }
 0x439   : > { %4483 = vmatmul.mubr.msk.f32.vlgmr.msra.gmra.mrb[8].mxu0 %vm645_vm2, %v1469_v41 }
 0x43a   : > { %4491 = vmatpush3.xpose.msk.msra.mxu0 %vm645_vm2, %v1636_v40  ;;  %4443 = vmatmul.mubr.msk.f32.vlgmr.msra.gmra.mrb[4].mxu1 %vm645_vm2, %v5583_v18 }
 0x43b   : > { %4492 = vmatprep.mubr.msk.f32.mxu0 %vm5178_vm0, %v5179_v1  ;;  %4500 = vmatprep.subr.mxu0 %v5179_v1 }
 0x43c   : > { %v1634_v42 = vpop.permute.xlu1 %1633  ;;  %4447 = vmatprep.mubr.msk.f32.mxu1 %vm5178_vm0, %v5179_v1 }
 0x43d   : > { %4493 = vmatmul.mubr.msk.f32.vlgmr.msra.gmra.mrb[10].mxu0 %vm645_vm2, %v1634_v42 }
 0x43e   : > { %4501 = vmatpush3.xpose.msk.msra.mxu0 %vm645_vm2, %v1801_v43  ;;  %4502 = vmatprep.mubr.msk.f32.mxu0 %vm5178_vm0, %v5179_v1 }
 0x43f   : > { %4673 = vmatprep.subr.bf16.mxu0 %v5177_v0 }
 0x440   : > { %v1799_v44 = vpop.permute.xlu1 %1798 }
 0x441   : > { %4503 = vmatmul.mubr.msk.f32.vlgmr.msra.gmra.mrb[12].mxu0 %vm645_vm2, %v1799_v44 }
 0x442   : > { %4518 = vmatprep.mubr.msk.f32.mxu0 %vm5178_vm0, %v5179_v1 }
 0x465   : > { %v1212_v45 = vpop.f32.mrb[4].mxu0 }
 0x466   : > { %v4464_v46 = vpop.f32.mrb[5].mxu0  ;;  %v1216_v62 = vsel %vm720_vm3, %v1212_v45, -inf }
 0x471   : > { %v1053_v47 = vpop.xlane.xlu1 %1052 }
 0x472   : > { %v1054_v48 = vsub.f32 %v5591_v24, %v1053_v47 }
 0x474   : > { %v1055_v51 = vmul.f32 1.442695, %v1054_v48 }
 0x476   : > { %4851 = vpow2.f32 %v1055_v51 }
 0x480   : > { %v5656_v4 = vpop.eup %4851 }
 0x481   : > { %v1057_v6 = vsel %vm720_vm3, %v5656_v4, 0.0 }
 0x504   : > { %v1377_v49 = vpop.f32.mrb[6].mxu0 }
 0x505   : > { %v4474_v50 = vpop.f32.mrb[7].mxu0  ;;  %v1381_v5 = vsel %vm720_vm3, %v1377_v49, -inf }
 0x509   : > { %v5650_v52 = vpop.f32.mrb[2].mxu1 }
 0x50a   : > { %v4439_v53 = vpop.f32.mrb[3].mxu1 }
 0x50c   : > { %v1542_v54 = vpop.f32.mrb[8].mxu0 }
 0x50d   : > { %v882_v55 = vpop.f32.mrb[4].mxu1  ;;  %v4484_v56 = vpop.f32.mrb[9].mxu0  ;;  %v1546_v57 = vsel %vm720_vm3, %v1542_v54, -inf }
 0x50e   : > { %v4444_v58 = vpop.f32.mrb[5].mxu1  ;;  %1547 = vmax.xlane.f32.xlu1 %v1546_v57  ;;  %v886_v59 = vsel %vm720_vm3, %v882_v55, -inf }
 0x50f   : > { %887 = vmax.xlane.f32.xlu0 %v886_v59 }
 0x510   : > { %v1707_v60 = vpop.f32.mrb[10].mxu0 }
 0x511   : > { %v4494_v61 = vpop.f32.mrb[11].mxu0  ;;  %v1711_v7 = vsel %vm720_vm3, %v1707_v60, -inf }
 0x513   : > { %1217 = vmax.xlane.f32.xlu0 %v1216_v62 }
 0x514   : > { %v1872_v63 = vpop.f32.mrb[12].mxu0 }
 0x515   : > { %v4504_v2 = vpop.f32.mrb[13].mxu0  ;;  %v1876_v3 = vsel %vm720_vm3, %v1872_v63, -inf }
 0x516   : > { %1877 = vmax.xlane.f32.xlu1 %v1876_v3 }
 0x517   : > { %1382 = vmax.xlane.f32.xlu0 %v1381_v5 }
 0x51a   : > { %1058 = vadd.xlane.f32.xlu1 %v1057_v6 }
 0x51b   : > { %1712 = vmax.xlane.f32.xlu0 %v1711_v7 }
 0x59b   : > { %v1548_v8 = vpop.xlane.xlu1 %1547 }
 0x59c   : > { %v888_v9 = vpop.xlane.xlu0 %887  ;;  %v1549_v11 = vsub.f32 %v1542_v54, %v1548_v8 }
 0x59d   : > { %v889_v21 = vsub.f32 %v882_v55, %v888_v9  ;;  %v2003_v9 = vld [vmem:[#allocation8] sm:$0xff] }
 0x59e   : > { %v1550_v15 = vmul.f32 1.442695, %v1549_v11  ;;  %v2004_v11 = vld [vmem:[#allocation8 + $0x8] sm:$0xff] }
 0x59f   : > { %v890_v26 = vmul.f32 1.442695, %v889_v21 }
 0x5a0   : > { %v1218_v12 = vpop.xlane.xlu0 %1217 }
 0x5a1   : > { %v1219_v14 = vsub.f32 %v1212_v45, %v1218_v12 }
 0x5a3   : > { %v1220_v16 = vmul.f32 1.442695, %v1219_v14  ;;  %v1878_v17 = vpop.xlane.xlu1 %1877  ;;  %v4674_v14 = vpack.c.bf16 %v2004_v11, %v2003_v9 }
 0x5a4   : > { %v1879_v18 = vsub.f32 %v1872_v63, %v1878_v17  ;;  %v1383_v19 = vpop.xlane.xlu0 %1382  ;;  %v2006_v17 = vld [vmem:[#allocation8 + $0x18] sm:$0xff] }
 0x5a5   : > { %4853 = vpow2.f32 %v1220_v16  ;;  %v1384_v20 = vsub.f32 %v1377_v49, %v1383_v19  ;;  %4675 = vmatpush3.bf16.msra.mxu0 %v4674_v14  ;;  %v2005_v16 = vld [vmem:[#allocation8 + $0x10] sm:$0xff] }
 0x5a6   : > { %4855 = vpow2.f32 %v1550_v15  ;;  %v1880_v22 = vmul.f32 1.442695, %v1879_v18  ;;  %4676 = vmatprep.subr.bf16.mxu0 %v5177_v0  ;;  %v4677_v19 = vpack.c.bf16 %v2006_v17, %v2005_v16 }
 0x5a7   : > { %v1385_v23 = vmul.f32 1.442695, %v1384_v20  ;;  %v1059_v40 = vpop.xlane.xlu1 %1058 }
 0x5a8   : > { %v1713_v24 = vpop.xlane.xlu0 %1712 }
 0x5a9   : > { %4857 = vpow2.f32 %v1385_v23  ;;  %v1714_v25 = vsub.f32 %v1707_v60, %v1713_v24  ;;  %4678 = vmatpush3.bf16.msra.mxu0 %v4677_v19 }
 0x5aa   : > { %4859 = vpow2.f32 %v1880_v22  ;;  %4685 = vmatprep.subr.bf16.mxu0 %v5177_v0 }
 0x5ab   : > { %v1715_v27 = vmul.f32 1.442695, %v1714_v25 }
 0x5ad   : > { %4861 = vpow2.f32 %v1715_v27 }
 0x5ae   : > { %4863 = vpow2.f32 %v890_v26 }
 0x5af   : > { %v5662_v28 = vpop.eup %4853 }
 0x5b0   : > { %v1222_v29 = vsel %vm720_vm3, %v5662_v28, 0.0  ;;  %v5666_v30 = vpop.eup %4855 }
 0x5b1   : > { %1223 = vadd.xlane.f32.xlu0 %v1222_v29  ;;  %v1552_v32 = vsel %vm720_vm3, %v5666_v30, 0.0 }
 0x5b3   : > { %v5668_v31 = vpop.eup %4857 }
 0x5b4   : > { %v1387_v33 = vsel %vm720_vm3, %v5668_v31, 0.0  ;;  %v5674_v34 = vpop.eup %4859 }
 0x5b5   : > { %1553 = vadd.xlane.f32.xlu0 %v1552_v32  ;;  %1388 = vadd.xlane.f32.xlu1 %v1387_v33  ;;  %v1882_v37 = vsel %vm720_vm3, %v5674_v34, 0.0 }
 0x5b7   : > { %v5676_v35 = vpop.eup %4861 }
 0x5b8   : > { %v1717_v36 = vsel %vm720_vm3, %v5676_v35, 0.0  ;;  %v4864_v38 = vpop.eup %4863 }
 0x5b9   : > { %1718 = vadd.xlane.f32.xlu1 %v1717_v36  ;;  %1883 = vadd.xlane.f32.xlu0 %v1882_v37  ;;  %v892_v39 = vsel %vm720_vm3, %v4864_v38, 0.0 }
 0x5bd   : > { %893 = vadd.xlane.f32.xlu0 %v892_v39 }
 0x5ca   : > { %897 = vrot.lane.b32.xlu1 %v5558_v13, %s6084_s26  ;;  %s6085_s26 = smov 36  }
 0x5ce   : > { %1227 = vrot.lane.b32.xlu1 %v5558_v13, %s6096_s24  ;;  %s6132_s24 = sld [smem:[#allocation24_spill]] }
 0x5d2   : > { %1392 = vrot.lane.b32.xlu1 %v5558_v13, %s6090_s18  ;;  %s6093_s18 = smov 24  }
 0x5d3   : > { %1062 = vrot.lane.b32.xlu0 %v5558_v13, %s6097_s20  ;;  %s6133_s20 = sld [smem:[#allocation25_spill]] }
 0x5d4   : > { %v4261_v11 = vld [vmem:[%s6132_s24] ss:$0 sm:$0xff] }
 0x5d6   : > { %1722 = vrot.lane.b32.xlu1 %v5558_v13, %s6086_s22  ;;  %s6089_s22 = smov 8  }
 0x5d7   : > { %1557 = vrot.lane.b32.xlu0 %v5558_v13, %s6087_s28  ;;  %s6091_s28 = smov 12  }
 0x5d9   : > { %v4263_v17 = vld [vmem:[%s6133_s20] ss:$0 sm:$0xff] }
 0x5db   : > { %1887 = vrot.lane.b32.xlu0 %v5558_v13, %s6085_s26  ;;  %s6088_s26 = smov 4  }
 0x63e   : > { %v1224_v41 = vpop.xlane.xlu0 %1223 }
 0x642   : > { %v1554_v42 = vpop.xlane.xlu0 %1553  ;;  %v1389_v43 = vpop.xlane.xlu1 %1388 }
 0x646   : > { %v1884_v44 = vpop.xlane.xlu0 %1883  ;;  %v1719_v45 = vpop.xlane.xlu1 %1718 }
 0x64a   : > { %v894_v46 = vpop.xlane.xlu0 %893  ;;  %v898_v47 = vpop.permute.xlu1 %897 }
 0x64b   : > { %4865 = vrcp.f32 %v894_v46  ;;  %4446 = vmatpush3.msra.mxu1 %v898_v47 }
 0x64c   : > { %4455 = vmatprep.subr.mxu1 %v5179_v1  ;;  %4867 = vrcp.f32 %v1059_v40 }
 0x64d   : > { %4869 = vrcp.f32 %v1224_v41 }
 0x64e   : > { %4871 = vrcp.f32 %v1389_v43  ;;  %v1063_v51 = vpop.permute.xlu0 %1062  ;;  %v1228_v53 = vpop.permute.xlu1 %1227 }
 0x64f   : > { %4873 = vrcp.f32 %v1554_v42 }
 0x650   : > { %4875 = vrcp.f32 %v1719_v45 }
 0x651   : > { %4877 = vrcp.f32 %v1884_v44 }
 0x652   : > { %v1393_v57 = vpop.permute.xlu1 %1392  ;;  %v1558_v60 = vpop.permute.xlu0 %1557 }
 0x655   : > { %v4866_v48 = vpop.eup %4865 }
 0x656   : > { %v896_v49 = vmul.f32 %v4866_v48, %v4864_v38  ;;  %v4868_v50 = vpop.eup %4867  ;;  %v1723_v63 = vpop.permute.xlu1 %1722 }
 0x657   : > { %v1061_v13 = vmul.f32 %v4868_v50, %v5656_v4  ;;  %v4870_v54 = vpop.eup %4869  ;;  %v1888_v4 = vpop.permute.xlu0 %1887 }
 0x658   : > { %4448 = vmatmul.mubr.msk.f32.vlgmr.msra.gmra.mrb[6].mxu1 %vm720_vm3, %v896_v49  ;;  %v1226_v55 = vmul.f32 %v4870_v54, %v5662_v28  ;;  %v4872_v56 = vpop.eup %4871 }
 0x659   : > { %4456 = vmatpush3.msra.mxu1 %v1063_v51  ;;  %4457 = vmatprep.mubr.msk.f32.mxu1 %vm5178_vm0, %v5179_v1  ;;  %v1391_v58 = vmul.f32 %v4872_v56, %v5668_v31  ;;  %v4874_v59 = vpop.eup %4873  ;;  %v2121_v56 = vld [vmem:[#allocation10 + $0x18] sm:$0xff] }
 0x65a   : > { %4465 = vmatprep.subr.mxu1 %v5179_v1  ;;  %v1556_v61 = vmul.f32 %v4874_v59, %v5666_v30  ;;  %v4876_v62 = vpop.eup %4875 }
 0x65b   : > { %v1721_v2 = vmul.f32 %v4876_v62, %v5676_v35  ;;  %v4878_v3 = vpop.eup %4877 }
 0x65c   : > { %4458 = vmatmul.mubr.msk.f32.vlgmr.msra.gmra.mrb[8].mxu1 %vm720_vm3, %v1061_v13  ;;  %v1886_v5 = vmul.f32 %v4878_v3, %v5674_v34  ;;  %v2118_v13 = vld [vmem:[#allocation10] sm:$0xff] }
 0x65d   : > { %4466 = vmatpush3.msra.mxu1 %v1228_v53  ;;  %4467 = vmatprep.mubr.msk.f32.mxu1 %vm5178_vm0, %v5179_v1  ;;  %v2119_v53 = vld [vmem:[#allocation10 + $0x8] sm:$0xff] }
 0x65e   : > { %4475 = vmatprep.subr.mxu1 %v5179_v1  ;;  %v4680_v54 = vpack.c.bf16 %v2119_v53, %v2118_v13 }
 0x660   : > { %4468 = vmatmul.mubr.msk.f32.vlgmr.msra.gmra.mrb[10].mxu1 %vm720_vm3, %v1226_v55  ;;  %v2120_v55 = vld [vmem:[#allocation10 + $0x10] sm:$0xff] }
 0x661   : > { %4476 = vmatpush3.msra.mxu1 %v1393_v57  ;;  %4477 = vmatprep.mubr.msk.f32.mxu1 %vm5178_vm0, %v5179_v1  ;;  %v4683_v57 = vpack.c.bf16 %v2121_v56, %v2120_v55 }
 0x662   : > { %4485 = vmatprep.subr.mxu1 %v5179_v1 }
 0x664   : > { %4478 = vmatmul.mubr.msk.f32.vlgmr.msra.gmra.mrb[12].mxu1 %vm720_vm3, %v1391_v58  ;;  %v2204_v58 = vld [vmem:[#allocation11 + $0x8] sm:$0xff] }
 0x665   : > { %4486 = vmatpush3.msra.mxu1 %v1558_v60  ;;  %4487 = vmatprep.mubr.msk.f32.mxu1 %vm5178_vm0, %v5179_v1 }
 0x666   : > { %4495 = vmatprep.subr.mxu1 %v5179_v1 }
 0x668   : > { %4488 = vmatmul.mubr.msk.f32.vlgmr.msra.gmra.mrb[14].mxu1 %vm720_vm3, %v1556_v61 }
 0x669   : > { %4496 = vmatpush3.msra.mxu1 %v1723_v63  ;;  %4497 = vmatprep.mubr.msk.f32.mxu1 %vm5178_vm0, %v5179_v1 }
 0x66a   : > { %4505 = vmatprep.subr.mxu1 %v5179_v1 }
 0x66c   : > { %4498 = vmatmul.mubr.msk.f32.vlgmr.msra.gmra.mrb[16].mxu1 %vm720_vm3, %v1721_v2  ;;  %v4259_v2 = vld [vmem:[%s6057_s6] ss:$0 sm:$0xff] }
 0x66d   : > { %4506 = vmatpush3.msra.mxu1 %v1888_v4  ;;  %4507 = vmatprep.mubr.msk.f32.mxu1 %vm5178_vm0, %v5179_v1  ;;  %v4260_v4 = vld [vmem:[%s6058_s7] ss:$0 sm:$0xff] }
 0x66e   : > { %4679 = vmatprep.subr.bf16.mxu1 %v5177_v0 }
 0x670   : > { %4508 = vmatmul.mubr.msk.f32.vlgmr.msra.gmra.mrb[18].mxu1 %vm720_vm3, %v1886_v5 }
 0x671   : > { %4529 = vmatprep.mubr.msk.f32.mxu1 %vm5178_vm0, %v5179_v1  ;;  %4681 = vmatpush3.bf16.msra.mxu1 %v4680_v54 }
 0x672   : > { %4682 = vmatprep.subr.bf16.mxu1 %v5177_v0 }
 0x675   : > { %4684 = vmatpush3.bf16.msra.mxu1 %v4683_v57 }
 0x676   : > { %4691 = vmatprep.subr.bf16.mxu1 %v5177_v0 }
 0x72b   : > { %v969_v6 = vpop.f32.mrb[6].mxu1 }
 0x72c   : > { %1964 = vrot.lane.b32.xlu1 %v969_v6, %s6088_s26  ;;  %v4449_v7 = vpop.f32.mrb[7].mxu1  ;;  %s6095_s26 = smov 16  }
 0x72d   : > { %v2205_v7 = vld [vmem:[#allocation11 + $0x10] sm:$0xff] }
 0x72f   : > { %v1134_v8 = vpop.f32.mrb[8].mxu1 }
 0x730   : > { %1968 = vrot.lane.b32.xlu0 %v1134_v8, %s6089_s22  ;;  %v4459_v12 = vpop.f32.mrb[9].mxu1  ;;  %s6094_s22 = smov 20   ;;  %v2206_v8 = vld [vmem:[#allocation11 + $0x18] sm:$0xff] }
 0x731   : > { %v4689_v9 = vpack.c.bf16 %v2206_v8, %v2205_v7 }
 0x733   : > { %v1299_v15 = vpop.f32.mrb[10].mxu1 }
 0x734   : > { %1972 = vrot.lane.b32.xlu1 %v1299_v15, %s6091_s28  ;;  %v4469_v18 = vpop.f32.mrb[11].mxu1  ;;  %s6092_s28 = smov 28  }
 0x737   : > { %v1464_v20 = vpop.f32.mrb[12].mxu1 }
 0x738   : > { %1976 = vrot.lane.b32.xlu0 %v1464_v20, %s6095_s26  ;;  %v4479_v21 = vpop.f32.mrb[13].mxu1  ;;  %s6144_s26 = smov 76  }
 0x73b   : > { %v1629_v22 = vpop.f32.mrb[14].mxu1 }
 0x73c   : > { %1980 = vrot.lane.b32.xlu1 %v1629_v22, %s6094_s22  ;;  %v4489_v23 = vpop.f32.mrb[15].mxu1  ;;  %s6134_s22 = sld [smem:[#allocation26_spill]] }
 0x73f   : > { %v1794_v24 = vpop.f32.mrb[16].mxu1 }
 0x740   : > { %1984 = vrot.lane.b32.xlu0 %v1794_v24, %s6093_s18  ;;  %v4499_v25 = vpop.f32.mrb[17].mxu1  ;;  %s6140_s18 = smov 84  }
 0x743   : > { %v1959_v26 = vpop.f32.mrb[18].mxu1 }
 0x744   : > { %1988 = vrot.lane.b32.xlu1 %v1959_v26, %s6092_s28  ;;  %v4509_v27 = vpop.f32.mrb[19].mxu1  ;;  %s6137_s28 = smov 116  }
 0x79e   : > { %v1965_v28 = vpop.permute.xlu1 %1964 }
 0x79f   : > { %v1991_v32 = vsel %vm645_vm2, %v5650_v52, %v1965_v28  ;;  %v4257_v52 = vld [vmem:[%s6056_s5] ss:$0 sm:$0xff]  ;;  %v2318_v28 = vld [vmem:[#allocation7 + $0x20] sm:$0xff] }
 0x7a2   : > { %v1969_v29 = vpop.permute.xlu0 %1968 }
 0x7a3   : > { %v1992_v33 = vsel %vm720_vm3, %v1991_v32, %v1969_v29  ;;  %v2319_v29 = vld [vmem:[#allocation7 + $0x28] sm:$0xff]  ;;  %v2321_v32 = vld [vmem:[#allocation7 + $0x38] sm:$0xff] }
 0x7a6   : > { %v1973_v30 = vpop.permute.xlu1 %1972 }
 0x7a7   : > { %v1994_v35 = vsel %vm1993_vm4, %v1992_v33, %v1973_v30  ;;  %v4692_v30 = vpack.c.bf16 %v2319_v29, %v2318_v28 }
 0x7aa   : > { %v1977_v31 = vpop.permute.xlu0 %1976 }
 0x7ab   : > { %v1996_v37 = vsel %vm1995_vm5, %v1994_v35, %v1977_v31  ;;  %v2320_v31 = vld [vmem:[#allocation7 + $0x30] sm:$0xff] }
 0x7ac   : > { %v4695_v33 = vpack.c.bf16 %v2321_v32, %v2320_v31 }
 0x7ae   : > { %v1981_v34 = vpop.permute.xlu1 %1980 }
 0x7af   : > { %v1998_v38 = vsel %vm1997_vm6, %v1996_v37, %v1981_v34 }
 0x7b2   : > { %v1985_v36 = vpop.permute.xlu0 %1984 }
 0x7b3   : > { %v2000_v39 = vsel %vm1999_vm7, %v1998_v38, %v1985_v36  ;;  %v4265_v38 = vld [vmem:[%s6134_s22] ss:$0 sm:$0xff] }
 0x7b6   : > { %v1989_v40 = vpop.permute.xlu1 %1988 }
 0x7b7   : > { %v2002_v41 = vsel %vm2001_vm8, %v2000_v39, %v1989_v40  ;;  %v4266_v40 = vld [vmem:[%s6135_s11] ss:$0 sm:$0xff] }
 0x7b8   : > { %4519 = vmatmul.mubr.msk.f32.vlgmr.msra.gmra.mrb[14].mxu0 %vm568_vm1, %v2002_v41 }
 0x7b9   : > { %4540 = vmatprep.mubr.msk.f32.mxu0 %vm5178_vm0, %v5179_v1 }
 0x88b   : > { %v2083_v42 = vpop.f32.mrb[14].mxu0 }
 0x88c   : > { %v2084_v43 = vadd.f32 %v4257_v52, %v2083_v42  ;;  %v4520_v44 = vpop.f32.mrb[15].mxu0  ;;  %v4268_v42 = vld [vmem:[%s6131_s3 + $0x1] ss:$0 sm:$0xff] }
 0x88e   : > { %v2087_v45 = vadd.f32 %v2084_v43, %v5548_v10  ;;  %v2203_v10 = vld [vmem:[#allocation11] sm:$0xff] }
 0x88f   : > { %v4686_v59 = vpack.c.bf16 %v2204_v58, %v2203_v10 }
 0x890   : > { %v2090_v46 = vsel %vm568_vm1, %v2087_v45, 0.0 }
 0x891   : > { %2091 = vadd.xlane.f32.xlu0 %v2090_v46  ;;  %4687 = vmatpush3.bf16.msra.mxu0 %v4686_v59 }
 0x892   : > { %4688 = vmatprep.subr.bf16.mxu0 %v5177_v0 }
 0x895   : > { %4690 = vmatpush3.bf16.msra.mxu0 %v4689_v9 }
 0x896   : > { %4554 = vmatprep.subr.mxu0 %v5179_v1 }
 0x91e   : > { %v2092_v47 = vpop.xlane.xlu0 %2091 }
 0x91f   : > { %v2094_v48 = vmul.f32 0.03125, %v2092_v47 }
 0x921   : > { %v2095_v49 = vsub.f32 %v2087_v45, %v2094_v48 }
 0x923   : > { %v2096_v50 = vmul.f32 %v2095_v49, %v2095_v49 }
 0x925   : > { %v2097_v51 = vsel %vm568_vm1, %v2096_v50, 0.0 }
 0x926   : > { %2098 = vadd.xlane.f32.xlu1 %v2097_v51 }
 0x9b3   : > { %v2099_v60 = vpop.xlane.xlu1 %2098 }
 0x9b4   : > { %v2100_v61 = vmul.f32 0.03125, %v2099_v60 }
 0x9b6   : > { %v2101_v62 = vadd.f32 1e-05, %v2100_v61 }
 0x9b8   : > { %4879 = vrsqrt.f32 %v2101_v62 }
 0x9c2   : > { %v4880_v63 = vpop.eup %4879 }
 0x9c3   : > { %v2103_v3 = vmul.f32 %v4880_v63, %v2095_v49 }
 0x9c5   : > { %v2110_v5 = vmul.f32 %v4259_v2, %v2103_v3 }
 0x9c7   : > { %v2117_v6 = vadd.f32 %v4260_v4, %v2110_v5 }
 0x9c9   : > { %4530 = vmatmul.mubr.msk.f32.vlgmr.msra.gmra.mrb[20].mxu1 %vm568_vm1, %v2117_v6 }
 0x9ca   : > { %4551 = vmatprep.mubr.msk.f32.mxu1 %vm5178_vm0, %v5179_v1  ;;  %4693 = vmatpush3.bf16.msra.mxu1 %v4692_v30 }
 0x9cb   : > { %4694 = vmatprep.subr.bf16.mxu1 %v5177_v0 }
 0x9ce   : > { %4696 = vmatpush3.bf16.msra.mxu1 %v4695_v33 }
 0x9cf   : > { %4559 = vmatprep.subr.mxu1 %v5179_v1 }
 0xa9c   : > { %v2198_v12 = vpop.f32.mrb[20].mxu1 }
 0xa9d   : > { %v2199_v14 = vadd.f32 %v4261_v11, %v2198_v12  ;;  %v4531_v15 = vpop.f32.mrb[21].mxu1 }
 0xa9f   : > { %v2202_v16 = vmax.f32 %v2199_v14, 0.0 }
 0xaa1   : > { %4541 = vmatmul.mubr.msk.f32.vlgmr.msra.gmra.mrb[16].mxu0 %vm568_vm1, %v2202_v16 }
 0xaa2   : > { %4556 = vmatprep.mubr.msk.f32.mxu0 %vm5178_vm0, %v5179_v1 }
 0xb74   : > { %v2283_v18 = vpop.f32.mrb[16].mxu0 }
 0xb75   : > { %v2284_v19 = vadd.f32 %v4263_v17, %v2283_v18  ;;  %v4542_v20 = vpop.f32.mrb[17].mxu0 }
 0xb77   : > { %v2287_v21 = vadd.f32 %v2284_v19, %v2117_v6 }
 0xb79   : > { %v2290_v22 = vsel %vm568_vm1, %v2287_v21, 0.0 }
 0xb7a   : > { %2291 = vadd.xlane.f32.xlu0 %v2290_v22 }
 0xc07   : > { %v2292_v23 = vpop.xlane.xlu0 %2291 }
 0xc08   : > { %v2293_v24 = vmul.f32 0.03125, %v2292_v23 }
 0xc0a   : > { %v2294_v25 = vsub.f32 %v2287_v21, %v2293_v24 }
 0xc0c   : > { %v2295_v26 = vmul.f32 %v2294_v25, %v2294_v25 }
 0xc0e   : > { %v2296_v27 = vsel %vm568_vm1, %v2295_v26, 0.0 }
 0xc0f   : > { %2297 = vadd.xlane.f32.xlu0 %v2296_v27 }
 0xc9c   : > { %v2298_v34 = vpop.xlane.xlu0 %2297 }
 0xc9d   : > { %v2299_v35 = vmul.f32 0.03125, %v2298_v34 }
 0xc9f   : > { %v2300_v36 = vadd.f32 1e-05, %v2299_v35 }
 0xca1   : > { %4881 = vrsqrt.f32 %v2300_v36 }
 0xcab   : > { %v4882_v37 = vpop.eup %4881 }
 0xcac   : > { %v2302_v39 = vmul.f32 %v4882_v37, %v2294_v25 }
 0xcae   : > { %v2309_v41 = vmul.f32 %v4265_v38, %v2302_v39 }
 0xcb0   : > { %v5789_v52 = vadd.f32 %v4266_v40, %v2309_v41 }
 0xcb2   : > { %4552 = vmatmul.mubr.msk.f32.vlgmr.msra.gmra.mrb[22].mxu1 %vm568_vm1, %v5789_v52 }
 0xcb3   : > { %4561 = vmatprep.mubr.msk.f32.mxu1 %vm5178_vm0, %v5179_v1 }
 0xd85   : > { %v2399_v43 = vpop.f32.mrb[22].mxu1 }
 0xd86   : > { %v5798_v44 = vadd.f32 %v4268_v42, %v2399_v43  ;;  %v4553_v45 = vpop.f32.mrb[23].mxu1 }
 0xd88   : > { %2569 = vrot.lane.b32.xlu0 %v5798_v44, %s5182_s25  ;;  %2404 = vrot.lane.b32.xlu1 %v5798_v44, %s5181_s13  ;;  %s6141_s25 = smov 108   ;;  %s6142_s13 = smov 80  }
 0xd8c   : > { %2732 = vrot.lane.b32.xlu0 %v5798_v44, %s5185_s1  ;;  %2567 = vrot.lane.b32.xlu1 %v5798_v44, %s6136_s27  ;;  %s6143_s1 = smov 104   ;;  %s6145_s27 = smov 100  }
 0xd90   : > { %2897 = vrot.lane.b32.xlu0 %v5798_v44, %s6137_s28  ;;  %2734 = vrot.lane.b32.xlu1 %v5798_v44, %s6138_s23  ;;  %s6146_s28 = smov 72   ;;  %s6147_s23 = smov 68  }
 0xd94   : > { %3062 = vrot.lane.b32.xlu0 %v5798_v44, %s6139_s9  ;;  %2899 = vrot.lane.b32.xlu1 %v5798_v44, %s6140_s18  ;;  %s6148_s9 = smov 64   ;;  %s6149_s18 = smov 56  }
 0xd98   : > { %3227 = vrot.lane.b32.xlu0 %v5798_v44, %s6141_s25  ;;  %3064 = vrot.lane.b32.xlu1 %v5798_v44, %s6142_s13  ;;  %s6150_s25 = smov 60   ;;  %s6151_s13 = smov 52  }
 0xd9c   : > { %3392 = vrot.lane.b32.xlu0 %v5798_v44, %s6143_s1  ;;  %3229 = vrot.lane.b32.xlu1 %v5798_v44, %s6144_s26  ;;  %s6152_s1 = smov 48   ;;  %s6153_s26 = smov 44  }
 0xda0   : > { %3557 = vrot.lane.b32.xlu0 %v5798_v44, %s6145_s27  ;;  %3394 = vrot.lane.b32.xlu1 %v5798_v44, %s6146_s28  ;;  %s6154_s27 = smov 40   ;;  %s6155_s28 = smov 36  }
 0xda4   : > { %3559 = vrot.lane.b32.xlu1 %v5798_v44, %s6147_s23  ;;  %s6156_s23 = smov 4  }
 0xda8   : > { %2491 = vrot.lane.b32.xlu1 %v5798_v44, %s6148_s9  ;;  %s6157_s9 = smov 8  }
 0xdfa   : > { %v2570_v46 = vpop.permute.xlu0 %2569  ;;  %v2405_v47 = vpop.permute.xlu1 %2404 }
 0xdfb   : > { %4555 = vmatpush3.xpose.msk.msra.mxu0 %vm645_vm2, %v2405_v47 }
 0xdfc   : > { %4564 = vmatprep.subr.mxu0 %v5179_v1 }
 0xdfe   : > { %v2733_v48 = vpop.permute.xlu0 %2732  ;;  %4557 = vmatmul.mubr.msk.f32.vlgmr.msra.gmra.mrb[18].mxu0 %vm645_vm2, %v5798_v44  ;;  %v2568_v49 = vpop.permute.xlu1 %2567 }
 0xdff   : > { %4565 = vmatpush3.xpose.msk.msra.mxu0 %vm645_vm2, %v2570_v46  ;;  %4566 = vmatprep.mubr.msk.f32.mxu0 %vm5178_vm0, %v5179_v1 }
 0xe00   : > { %4574 = vmatprep.subr.mxu0 %v5179_v1 }
 0xe02   : > { %v2898_v50 = vpop.permute.xlu0 %2897  ;;  %4567 = vmatmul.mubr.msk.f32.vlgmr.msra.gmra.mrb[20].mxu0 %vm645_vm2, %v2568_v49  ;;  %v2735_v51 = vpop.permute.xlu1 %2734 }
 0xe03   : > { %4575 = vmatpush3.xpose.msk.msra.mxu0 %vm645_vm2, %v2735_v51  ;;  %4576 = vmatprep.mubr.msk.f32.mxu0 %vm5178_vm0, %v5179_v1 }
 0xe04   : > { %4584 = vmatprep.subr.mxu0 %v5179_v1 }
 0xe06   : > { %4577 = vmatmul.mubr.msk.f32.vlgmr.msra.gmra.mrb[22].mxu0 %vm645_vm2, %v2733_v48  ;;  %v2900_v13 = vpop.permute.xlu1 %2899  ;;  %v3063_v53 = vpop.permute.xlu0 %3062 }
 0xe07   : > { %4585 = vmatpush3.xpose.msk.msra.mxu0 %vm645_vm2, %v2900_v13  ;;  %4586 = vmatprep.mubr.msk.f32.mxu0 %vm5178_vm0, %v5179_v1 }
 0xe08   : > { %4594 = vmatprep.subr.mxu0 %v5179_v1 }
 0xe0a   : > { %4587 = vmatmul.mubr.msk.f32.vlgmr.msra.gmra.mrb[24].mxu0 %vm645_vm2, %v2898_v50  ;;  %v3065_v54 = vpop.permute.xlu1 %3064  ;;  %v3228_v55 = vpop.permute.xlu0 %3227 }
 0xe0b   : > { %4595 = vmatpush3.xpose.msk.msra.mxu0 %vm645_vm2, %v3065_v54  ;;  %4596 = vmatprep.mubr.msk.f32.mxu0 %vm5178_vm0, %v5179_v1 }
 0xe0c   : > { %4604 = vmatprep.subr.mxu0 %v5179_v1 }
 0xe0e   : > { %4597 = vmatmul.mubr.msk.f32.vlgmr.msra.gmra.mrb[26].mxu0 %vm645_vm2, %v3063_v53  ;;  %v3230_v56 = vpop.permute.xlu1 %3229  ;;  %v3393_v10 = vpop.permute.xlu0 %3392 }
 0xe0f   : > { %4605 = vmatpush3.xpose.msk.msra.mxu0 %vm645_vm2, %v3230_v56  ;;  %4606 = vmatprep.mubr.msk.f32.mxu0 %vm5178_vm0, %v5179_v1 }
 0xe10   : > { %4614 = vmatprep.subr.mxu0 %v5179_v1 }
 0xe12   : > { %4607 = vmatmul.mubr.msk.f32.vlgmr.msra.gmra.mrb[28].mxu0 %vm645_vm2, %v3228_v55  ;;  %v3395_v57 = vpop.permute.xlu1 %3394  ;;  %v3558_v59 = vpop.permute.xlu0 %3557 }
 0xe13   : > { %4615 = vmatpush3.xpose.msk.msra.mxu0 %vm645_vm2, %v3395_v57  ;;  %4616 = vmatprep.mubr.msk.f32.mxu0 %vm5178_vm0, %v5179_v1 }
 0xe14   : > { %4624 = vmatprep.subr.mxu0 %v5179_v1 }
 0xe16   : > { %4617 = vmatmul.mubr.msk.f32.vlgmr.msra.gmra.mrb[30].mxu0 %vm645_vm2, %v3393_v10  ;;  %v3560_v58 = vpop.permute.xlu1 %3559 }
 0xe17   : > { %4625 = vmatpush3.xpose.msk.msra.mxu0 %vm645_vm2, %v3560_v58  ;;  %4626 = vmatprep.mubr.msk.f32.mxu0 %vm5178_vm0, %v5179_v1 }
 0xe18   : > { %4697 = vmatprep.subr.bf16.mxu0 %v5177_v0 }
 0xe1a   : > { %4627 = vmatmul.mubr.msk.f32.vlgmr.msra.gmra.mrb[32].mxu0 %vm645_vm2, %v3558_v59  ;;  %v2492_v60 = vpop.permute.xlu1 %2491 }
 0xe1b   : > { %4560 = vmatpush3.msra.mxu1 %v2492_v60  ;;  %4642 = vmatprep.mubr.msk.f32.mxu0 %vm5178_vm0, %v5179_v1 }
 0xe1c   : > { %4569 = vmatprep.subr.mxu1 %v5179_v1 }
 0xed1   : > { %v2476_v61 = vpop.f32.mrb[18].mxu0 }
 0xed2   : > { %v4558_v62 = vpop.f32.mrb[19].mxu0  ;;  %v2480_v63 = vsel %vm720_vm3, %v2476_v61, -inf }
 0xed3   : > { %2481 = vmax.xlane.f32.xlu1 %v2480_v63 }
 0xed5   : > { %v2641_v2 = vpop.f32.mrb[20].mxu0 }
 0xed6   : > { %v4568_v3 = vpop.f32.mrb[21].mxu0  ;;  %v2645_v4 = vsel %vm720_vm3, %v2641_v2, -inf }
 0xed7   : > { %2646 = vmax.xlane.f32.xlu0 %v2645_v4 }
 0xed9   : > { %v2806_v5 = vpop.f32.mrb[22].mxu0 }
 0xeda   : > { %v4578_v6 = vpop.f32.mrb[23].mxu0  ;;  %v2810_v7 = vsel %vm720_vm3, %v2806_v5, -inf }
 0xedb   : > { %2811 = vmax.xlane.f32.xlu0 %v2810_v7 }
 0xedd   : > { %v2971_v8 = vpop.f32.mrb[24].mxu0 }
 0xede   : > { %v4588_v9 = vpop.f32.mrb[25].mxu0  ;;  %v2975_v11 = vsel %vm720_vm3, %v2971_v8, -inf }
 0xedf   : > { %2976 = vmax.xlane.f32.xlu1 %v2975_v11 }
 0xee1   : > { %v3136_v12 = vpop.f32.mrb[26].mxu0 }
 0xee2   : > { %v4598_v14 = vpop.f32.mrb[27].mxu0  ;;  %v3140_v15 = vsel %vm720_vm3, %v3136_v12, -inf }
 0xee3   : > { %3141 = vmax.xlane.f32.xlu0 %v3140_v15 }
 0xee5   : > { %v3301_v16 = vpop.f32.mrb[28].mxu0 }
 0xee6   : > { %v4608_v17 = vpop.f32.mrb[29].mxu0  ;;  %v3305_v18 = vsel %vm720_vm3, %v3301_v16, -inf }
 0xee7   : > { %3306 = vmax.xlane.f32.xlu1 %v3305_v18 }
 0xee9   : > { %v3466_v19 = vpop.f32.mrb[30].mxu0 }
 0xeea   : > { %v4618_v20 = vpop.f32.mrb[31].mxu0  ;;  %v3470_v21 = vsel %vm720_vm3, %v3466_v19, -inf }
 0xeeb   : > { %3471 = vmax.xlane.f32.xlu0 %v3470_v21 }
 0xeed   : > { %v3631_v22 = vpop.f32.mrb[32].mxu0 }
 0xeee   : > { %v4628_v23 = vpop.f32.mrb[33].mxu0  ;;  %v3635_v24 = vsel %vm720_vm3, %v3631_v22, -inf }
 0xef8   : > { %2821 = vrot.lane.b32.xlu1 %v5798_v44, %s6149_s18  ;;  %s6158_s18 = smov 12  }
 0xf01   : > { %2656 = vrot.lane.b32.xlu0 %v5798_v44, %s6150_s25  ;;  %s6159_s25 = smov 16  }
 0xf1c   : > { %3636 = vmax.xlane.f32.xlu1 %v3635_v24 }
 0xf2d   : > { %2986 = vrot.lane.b32.xlu1 %v5798_v44, %s6151_s13  ;;  %s6160_s13 = smov 20  }
 0xf60   : > { %v2482_v25 = vpop.xlane.xlu1 %2481 }
 0xf61   : > { %v2483_v26 = vsub.f32 %v2476_v61, %v2482_v25 }
 0xf63   : > { %v2484_v27 = vmul.f32 1.442695, %v2483_v26 }
 0xf64   : > { %v2647_v28 = vpop.xlane.xlu0 %2646 }
 0xf65   : > { %4883 = vpow2.f32 %v2484_v27  ;;  %v2648_v29 = vsub.f32 %v2641_v2, %v2647_v28 }
 0xf67   : > { %v2649_v30 = vmul.f32 1.442695, %v2648_v29 }
 0xf68   : > { %v2812_v31 = vpop.xlane.xlu0 %2811 }
 0xf69   : > { %4885 = vpow2.f32 %v2649_v30  ;;  %v2813_v32 = vsub.f32 %v2806_v5, %v2812_v31 }
 0xf6b   : > { %v2814_v33 = vmul.f32 1.442695, %v2813_v32 }
 0xf6c   : > { %v2977_v40 = vpop.xlane.xlu1 %2976 }
 0xf6d   : > { %4887 = vpow2.f32 %v2814_v33  ;;  %v2978_v41 = vsub.f32 %v2971_v8, %v2977_v40 }
 0xf6f   : > { %v4884_v34 = vpop.eup %4883  ;;  %v2979_v46 = vmul.f32 1.442695, %v2978_v41  ;;  %v3758_v41 = vld [vmem:[#allocation8 + $0x20] sm:$0xff] }
 0xf70   : > { %v2486_v35 = vsel %vm720_vm3, %v4884_v34, 0.0  ;;  %v3142_v42 = vpop.xlane.xlu0 %3141 }
 0xf71   : > { %2487 = vadd.xlane.f32.xlu0 %v2486_v35  ;;  %v3143_v45 = vsub.f32 %v3136_v12, %v3142_v42  ;;  %4889 = vpow2.f32 %v2979_v46  ;;  %v3759_v42 = vld [vmem:[#allocation8 + $0x28] sm:$0xff]  ;;  %v3760_v46 = vld [vmem:[#allocation8 + $0x30] sm:$0xff] }
 0xf73   : > { %v4886_v36 = vpop.eup %4885  ;;  %v3144_v49 = vmul.f32 1.442695, %v3143_v45 }
 0xf74   : > { %v2651_v37 = vsel %vm720_vm3, %v4886_v36, 0.0  ;;  %v3307_v43 = vpop.xlane.xlu1 %3306 }
 0xf75   : > { %2652 = vadd.xlane.f32.xlu1 %v2651_v37  ;;  %v3308_v47 = vsub.f32 %v3301_v16, %v3307_v43  ;;  %4891 = vpow2.f32 %v3144_v49  ;;  %v4698_v43 = vpack.c.bf16 %v3759_v42, %v3758_v41 }
 0xf77   : > { %v5890_v38 = vpop.eup %4887  ;;  %v3309_v50 = vmul.f32 1.442695, %v3308_v47  ;;  %4699 = vmatpush3.bf16.msra.mxu0 %v4698_v43  ;;  %v3761_v47 = vld [vmem:[#allocation8 + $0x38] sm:$0xff] }
 0xf78   : > { %v2816_v39 = vsel %vm720_vm3, %v5890_v38, 0.0  ;;  %v3472_v48 = vpop.xlane.xlu0 %3471  ;;  %v2822_v53 = vpop.permute.xlu1 %2821  ;;  %4700 = vmatprep.subr.bf16.mxu0 %v5177_v0  ;;  %v4701_v49 = vpack.c.bf16 %v3761_v47, %v3760_v46 }
 0xf79   : > { %2817 = vadd.xlane.f32.xlu0 %v2816_v39  ;;  %v3473_v51 = vsub.f32 %v3466_v19, %v3472_v48  ;;  %4893 = vpow2.f32 %v3309_v50 }
 0xf7b   : > { %v3474_v13 = vmul.f32 1.442695, %v3473_v51  ;;  %v4890_v54 = vpop.eup %4889  ;;  %4702 = vmatpush3.bf16.msra.mxu0 %v4701_v49 }
 0xf7c   : > { %v2981_v57 = vsel %vm720_vm3, %v4890_v54, 0.0  ;;  %v2657_v4 = vpop.permute.xlu0 %2656  ;;  %4709 = vmatprep.subr.bf16.mxu0 %v5177_v0 }
 0xf7d   : > { %4895 = vpow2.f32 %v3474_v13 }
 0xf7f   : > { %v4892_v55 = vpop.eup %4891 }
 0xf80   : > { %v3146_v60 = vsel %vm720_vm3, %v4892_v55, 0.0 }
 0xf83   : > { %v5899_v10 = vpop.eup %4893 }
 0xf84   : > { %v3311_v61 = vsel %vm720_vm3, %v5899_v10, 0.0 }
 0xf86   : > { %3151 = vrot.lane.b32.xlu1 %v5798_v44, %s6152_s1  ;;  %s6161_s1 = smov 24  }
 0xf87   : > { %v5904_v62 = vpop.eup %4895 }
 0xf88   : > { %v3476_v63 = vsel %vm720_vm3, %v5904_v62, 0.0 }
 0xf8f   : > { %3316 = vrot.lane.b32.xlu0 %v5798_v44, %s6153_s26  ;;  %s6162_s26 = smov 28  }
 0xfa9   : > { %v3637_v56 = vpop.xlane.xlu1 %3636 }
 0xfaa   : > { %v3638_v58 = vsub.f32 %v3631_v22, %v3637_v56  ;;  %2982 = vadd.xlane.f32.xlu1 %v2981_v57 }
 0xfac   : > { %v3639_v59 = vmul.f32 1.442695, %v3638_v58 }
 0xfad   : > { %v2987_v5 = vpop.permute.xlu1 %2986 }
 0xfae   : > { %4897 = vpow2.f32 %v3639_v59  ;;  %3147 = vadd.xlane.f32.xlu0 %v3146_v60  ;;  %3312 = vadd.xlane.f32.xlu1 %v3311_v61 }
 0xfb2   : > { %3477 = vadd.xlane.f32.xlu0 %v3476_v63 }
 0xfb8   : > { %v5908_v2 = vpop.eup %4897 }
 0xfb9   : > { %v3641_v3 = vsel %vm720_vm3, %v5908_v2, 0.0 }
 0xfba   : > { %3642 = vadd.xlane.f32.xlu0 %v3641_v3 }
 0xfbf   : > { %3481 = vrot.lane.b32.xlu1 %v5798_v44, %s6154_s27 }
 0xfd0   : > { %3646 = vrot.lane.b32.xlu0 %v5798_v44, %s6155_s28  ;;  %s4082_s28 = scalar_lea.sflag [#allocation4], %s5519_s4 }
 0xffe   : > { %v2488_v6 = vpop.xlane.xlu0 %2487 }
 0xfff   : > { %4899 = vrcp.f32 %v2488_v6 }
0x1002   : > { %v2653_v7 = vpop.xlane.xlu1 %2652 }
0x1003   : > { %4901 = vrcp.f32 %v2653_v7 }
0x1006   : > { %v2818_v8 = vpop.xlane.xlu0 %2817  ;;  %v3152_v16 = vpop.permute.xlu1 %3151 }
0x1007   : > { %4903 = vrcp.f32 %v2818_v8 }
0x1009   : > { %v4900_v9 = vpop.eup %4899 }
0x100a   : > { %v2490_v11 = vmul.f32 %v4900_v9, %v4884_v34  ;;  %v3317_v17 = vpop.permute.xlu0 %3316  ;;  %v4295_v9 = vld [vmem:[%s6056_s5 + $0x1] ss:$0 sm:$0xff] }
0x100c   : > { %4562 = vmatmul.mubr.msk.f32.vlgmr.msra.gmra.mrb[24].mxu1 %vm720_vm3, %v2490_v11 }
0x100d   : > { %v4902_v12 = vpop.eup %4901  ;;  %4570 = vmatpush3.msra.mxu1 %v2657_v4  ;;  %4571 = vmatprep.mubr.msk.f32.mxu1 %vm5178_vm0, %v5179_v1 }
0x100e   : > { %v2655_v14 = vmul.f32 %v4902_v12, %v4886_v36  ;;  %4579 = vmatprep.subr.mxu1 %v5179_v1 }
0x1010   : > { %4572 = vmatmul.mubr.msk.f32.vlgmr.msra.gmra.mrb[26].mxu1 %vm720_vm3, %v2655_v14 }
0x1011   : > { %v4904_v44 = vpop.eup %4903  ;;  %4580 = vmatpush3.msra.mxu1 %v2822_v53  ;;  %4581 = vmatprep.mubr.msk.f32.mxu1 %vm5178_vm0, %v5179_v1 }
0x1012   : > { %v2820_v15 = vmul.f32 %v4904_v44, %v5890_v38  ;;  %4589 = vmatprep.subr.mxu1 %v5179_v1 }
0x1014   : > { %4582 = vmatmul.mubr.msk.f32.vlgmr.msra.gmra.mrb[28].mxu1 %vm720_vm3, %v2820_v15 }
0x1015   : > { %4590 = vmatpush3.msra.mxu1 %v2987_v5  ;;  %4591 = vmatprep.mubr.msk.f32.mxu1 %vm5178_vm0, %v5179_v1 }
0x1016   : > { %4599 = vmatprep.subr.mxu1 %v5179_v1 }
0x1037   : > { %v2983_v18 = vpop.xlane.xlu1 %2982 }
0x1038   : > { %4905 = vrcp.f32 %v2983_v18 }
0x103b   : > { %v3148_v19 = vpop.xlane.xlu0 %3147  ;;  %v3313_v20 = vpop.xlane.xlu1 %3312 }
0x103c   : > { %4907 = vrcp.f32 %v3148_v19 }
0x103d   : > { %4909 = vrcp.f32 %v3313_v20 }
0x103f   : > { %v3478_v21 = vpop.xlane.xlu0 %3477  ;;  %v3482_v30 = vpop.permute.xlu1 %3481 }
0x1040   : > { %4911 = vrcp.f32 %v3478_v21  ;;  %v3877_v21 = vld [vmem:[#allocation10 + $0x28] sm:$0xff] }
0x1042   : > { %v4906_v22 = vpop.eup %4905 }
0x1043   : > { %v2985_v23 = vmul.f32 %v4906_v22, %v4890_v54 }
0x1045   : > { %4592 = vmatmul.mubr.msk.f32.vlgmr.msra.gmra.mrb[30].mxu1 %vm720_vm3, %v2985_v23  ;;  %v3878_v23 = vld [vmem:[#allocation10 + $0x30] sm:$0xff] }
0x1046   : > { %v4908_v24 = vpop.eup %4907  ;;  %4600 = vmatpush3.msra.mxu1 %v3152_v16  ;;  %4601 = vmatprep.mubr.msk.f32.mxu1 %vm5178_vm0, %v5179_v1 }
0x1047   : > { %v3150_v25 = vmul.f32 %v4908_v24, %v4892_v55  ;;  %v3643_v26 = vpop.xlane.xlu0 %3642  ;;  %4609 = vmatprep.subr.mxu1 %v5179_v1  ;;  %v4910_v27 = vpop.eup %4909  ;;  %v3879_v24 = vld [vmem:[#allocation10 + $0x38] sm:$0xff] }
0x1048   : > { %4913 = vrcp.f32 %v3643_v26  ;;  %v3315_v28 = vmul.f32 %v4910_v27, %v5899_v10  ;;  %v3964_v26 = vld [vmem:[#allocation11 + $0x28] sm:$0xff] }
0x1049   : > { %4602 = vmatmul.mubr.msk.f32.vlgmr.msra.gmra.mrb[32].mxu1 %vm720_vm3, %v3150_v25  ;;  %v4707_v25 = vpack.c.bf16 %v3879_v24, %v3878_v23 }
0x104a   : > { %4610 = vmatpush3.msra.mxu1 %v3317_v17  ;;  %4611 = vmatprep.mubr.msk.f32.mxu1 %vm5178_vm0, %v5179_v1  ;;  %v4912_v29 = vpop.eup %4911 }
0x104b   : > { %4619 = vmatprep.subr.mxu1 %v5179_v1  ;;  %v3480_v31 = vmul.f32 %v4912_v29, %v5904_v62  ;;  %v3647_v32 = vpop.permute.xlu0 %3646 }
0x104d   : > { %4612 = vmatmul.mubr.msk.f32.vlgmr.msra.gmra.mrb[34].mxu1 %vm720_vm3, %v3315_v28 }
0x104e   : > { %4620 = vmatpush3.msra.mxu1 %v3482_v30  ;;  %4621 = vmatprep.mubr.msk.f32.mxu1 %vm5178_vm0, %v5179_v1 }
0x104f   : > { %4629 = vmatprep.subr.mxu1 %v5179_v1 }
0x1051   : > { %4622 = vmatmul.mubr.msk.f32.vlgmr.msra.gmra.mrb[36].mxu1 %vm720_vm3, %v3480_v31 }
0x1052   : > { %v4914_v33 = vpop.eup %4913  ;;  %4630 = vmatpush3.msra.mxu1 %v3647_v32  ;;  %4631 = vmatprep.mubr.msk.f32.mxu1 %vm5178_vm0, %v5179_v1  ;;  %v4299_v32 = vld [vmem:[%s6057_s6 + $0x1] ss:$0 sm:$0xff] }
0x1053   : > { %v3645_v34 = vmul.f32 %v4914_v33, %v5908_v2  ;;  %4703 = vmatprep.subr.bf16.mxu1 %v5177_v0 }
0x1055   : > { %4632 = vmatmul.mubr.msk.f32.vlgmr.msra.gmra.mrb[38].mxu1 %vm720_vm3, %v3645_v34  ;;  %v4300_v34 = vld [vmem:[%s6058_s7 + $0x1] ss:$0 sm:$0xff] }
0x1056   : > { %4653 = vmatprep.mubr.msk.f32.mxu1 %vm5178_vm0, %v5179_v1 }
0x10df   : > { %v2563_v35 = vpop.f32.mrb[24].mxu1 }
0x10e0   : > { %v4563_v36 = vpop.f32.mrb[25].mxu1 }
0x10e3   : > { %v2728_v37 = vpop.f32.mrb[26].mxu1 }
0x10e4   : > { %3723 = vrot.lane.b32.xlu1 %v2728_v37, %s6156_s23  ;;  %v4573_v38 = vpop.f32.mrb[27].mxu1  ;;  %v3965_v37 = vld [vmem:[#allocation11 + $0x30] sm:$0xff] }
0x10e7   : > { %v2893_v39 = vpop.f32.mrb[28].mxu1 }
0x10e8   : > { %3727 = vrot.lane.b32.xlu0 %v2893_v39, %s6157_s9  ;;  %v4583_v40 = vpop.f32.mrb[29].mxu1  ;;  %v4302_v39 = vld [vmem:[%s6132_s24 + $0x1] ss:$0 sm:$0xff] }
0x1118   : > { %v3058_v45 = vpop.f32.mrb[30].mxu1 }
0x1119   : > { %3731 = vrot.lane.b32.xlu1 %v3058_v45, %s6158_s18  ;;  %v4593_v48 = vpop.f32.mrb[31].mxu1  ;;  %v4305_v45 = vld [vmem:[%s6133_s20 + $0x1] ss:$0 sm:$0xff] }
0x111c   : > { %v3223_v50 = vpop.f32.mrb[32].mxu1 }
0x111d   : > { %3735 = vrot.lane.b32.xlu0 %v3223_v50, %s6159_s25  ;;  %v4603_v51 = vpop.f32.mrb[33].mxu1  ;;  %s4312_s25 = sshll.u32 %s5307_s19, 7  ;;  %s5210_s19 = smov [#allocation13]  }
0x111e   : > { %s6006_s3 = scalar_lea.hbm %s6164_s2, %s4312_s25  ;;  %s5093_s9 = sshll.u32 %s5210_s19, 4  ;;  %s5094_s9 = int_to_ptr.vmem [resolvable:$false] %s5093_s9 }
0x111f   : > { %s5095_s18 = scalar_lea.vmem %s5094_s9, 256 }
0x1120   : > { %v3388_v13 = vpop.f32.mrb[34].mxu1 }
0x1121   : > { %3739 = vrot.lane.b32.xlu1 %v3388_v13, %s6160_s13  ;;  %v4613_v53 = vpop.f32.mrb[35].mxu1  ;;  %s6163_s13 = sshll.u32 %s5519_s4, 3 }
0x1124   : > { %v3553_v54 = vpop.f32.mrb[36].mxu1 }
0x1125   : > { %3743 = vrot.lane.b32.xlu0 %v3553_v54, %s6161_s1  ;;  %v4623_v55 = vpop.f32.mrb[37].mxu1  ;;  %s553_s1 = scalar_lea.vmem [#allocation13], %s6163_s13 }
0x1128   : > { %v3718_v56 = vpop.f32.mrb[38].mxu1 }
0x1129   : > { %3747 = vrot.lane.b32.xlu1 %v3718_v56, %s6162_s26  ;;  %v4633_v57 = vpop.f32.mrb[39].mxu1  ;;  %s4095_s26 = sshll.u32 %s553_s1, 4  ;;  %s6008_s26 = int_to_ptr.vmem [resolvable:$true] %s4095_s26 }
0x112a   : > { %s5089_s23 = scalar_lea.vmem %s6008_s26, 128  ;;  %p5096_p4 = scmp.lt.s32.totalorder %s6008_s26, %s5094_s9 }
0x112b   : > { %p5090_p11 = scmp.ne.s32.totalorder %s6008_s26, %s5089_s23  ;;  %p5097_p1 = scmp.lt.s32.totalorder %s5095_s18, %s5089_s23 }
0x112d   : > { %p5091_p5 = pnand %p5090_p11, %p6165_p13  ;;  %p5098_p3 = por %p5097_p1, %p5096_p4 }
0x112f   : > { %p5092_p7 = pneg %p5091_p5 }
0x1131   : > { %p5099_p9 = pnand %p5098_p3, %p5092_p7 }
0x1156   : > { %v3724_v10 = vpop.permute.xlu1 %3723 }
0x1157   : > { %v3750_v61 = vsel %vm645_vm2, %v2563_v35, %v3724_v10 }
0x115a   : > { %v3728_v58 = vpop.permute.xlu0 %3727 }
0x115b   : > { %v3751_v62 = vsel %vm720_vm3, %v3750_v61, %v3728_v58  ;;  %v4310_v61 = vld [vmem:[%s6135_s11 + $0x1] ss:$0 sm:$0xff] }
0x118b   : > { %v3732_v59 = vpop.permute.xlu1 %3731 }
0x118c   : > { %v3752_v2 = vsel %vm1993_vm4, %v3751_v62, %v3732_v59  ;;  %v4309_v59 = vld [vmem:[%s6134_s22 + $0x1] ss:$0 sm:$0xff] }
0x118f   : > { %v3736_v60 = vpop.permute.xlu0 %3735 }
0x1190   : > { %v3753_v4 = vsel %vm1995_vm5, %v3752_v2, %v3736_v60 }
0x1193   : > { %v3740_v63 = vpop.permute.xlu1 %3739 }
0x1194   : > { %v3754_v5 = vsel %vm1997_vm6, %v3753_v4, %v3740_v63 }
0x1197   : > { %v3744_v3 = vpop.permute.xlu0 %3743 }
0x1198   : > { %v3755_v6 = vsel %vm1999_vm7, %v3754_v5, %v3744_v3 }
0x119b   : > { %v3748_v7 = vpop.permute.xlu1 %3747 }
0x119c   : > { %v3756_v8 = vsel %vm2001_vm8, %v3755_v6, %v3748_v7 }
0x119d   : > { %4643 = vmatmul.mubr.msk.f32.vlgmr.msra.gmra.mrb[34].mxu0 %vm568_vm1, %v3756_v8 }
0x119e   : > { %4664 = vmatprep.mubr.msk.f32.mxu0 %vm5178_vm0, %v5179_v1  ;;  %v3876_v1 = vld [vmem:[#allocation10 + $0x20] sm:$0xff] }
0x119f   : > { %v4704_v22 = vpack.c.bf16 %v3877_v21, %v3876_v1 }
0x11a1   : > { %4705 = vmatpush3.bf16.msra.mxu1 %v4704_v22 }
0x11a2   : > { %4706 = vmatprep.subr.bf16.mxu1 %v5177_v0 }
0x11a5   : > { %4708 = vmatpush3.bf16.msra.mxu1 %v4707_v25 }
0x1270   : > { %v3839_v11 = vpop.f32.mrb[34].mxu0 }
0x1271   : > { %v3840_v12 = vadd.f32 %v4295_v9, %v3839_v11  ;;  %v4644_v14 = vpop.f32.mrb[35].mxu0 }
0x1273   : > { %v3843_v44 = vadd.f32 %v3840_v12, %v5789_v52  ;;  %v3963_v52 = vld [vmem:[#allocation11 + $0x20] sm:$0xff] }
0x1274   : > { %v4710_v27 = vpack.c.bf16 %v3964_v26, %v3963_v52 }
0x1275   : > { %v3848_v15 = vsel %vm568_vm1, %v3843_v44, 0.0 }
0x1276   : > { %3849 = vadd.xlane.f32.xlu0 %v3848_v15  ;;  %4711 = vmatpush3.bf16.msra.mxu0 %v4710_v27 }
0x1277   : > { %4712 = vmatprep.subr.bf16.mxu0 %v5177_v0  ;;  %v3966_v0 = vld [vmem:[#allocation11 + $0x38] sm:$0xff] }
0x1278   : > { %v4713_v38 = vpack.c.bf16 %v3966_v0, %v3965_v37 }
0x127a   : > { %4714 = vmatpush3.bf16.msra.mxu0 %v4713_v38 }
0x1303   : > { %v3850_v16 = vpop.xlane.xlu0 %3849 }
0x1304   : > { %v3851_v17 = vmul.f32 0.03125, %v3850_v16 }
0x1306   : > { %v3852_v18 = vsub.f32 %v3843_v44, %v3851_v17 }
0x1308   : > { %v3853_v19 = vmul.f32 %v3852_v18, %v3852_v18 }
0x130a   : > { %v3854_v20 = vsel %vm568_vm1, %v3853_v19, 0.0 }
0x130b   : > { %3855 = vadd.xlane.f32.xlu1 %v3854_v20 }
0x1398   : > { %v3856_v28 = vpop.xlane.xlu1 %3855 }
0x1399   : > { %v3857_v29 = vmul.f32 0.03125, %v3856_v28 }
0x139b   : > { %v3858_v30 = vadd.f32 1e-05, %v3857_v29 }
0x139d   : > { %4915 = vrsqrt.f32 %v3858_v30 }
0x13a7   : > { %v4916_v31 = vpop.eup %4915 }
0x13a8   : > { %v3860_v33 = vmul.f32 %v4916_v31, %v3852_v18 }
0x13aa   : > { %v3867_v35 = vmul.f32 %v4299_v32, %v3860_v33 }
0x13ac   : > { %v3874_v36 = vadd.f32 %v4300_v34, %v3867_v35 }
0x13ae   : > { %4654 = vmatmul.mubr.msk.f32.vlgmr.msra.gmra.mrb[40].mxu1 %vm568_vm1, %v3874_v36 }
0x1481   : > { %v3957_v40 = vpop.f32.mrb[40].mxu1 }
0x1482   : > { %v3958_v41 = vadd.f32 %v4302_v39, %v3957_v40  ;;  %v4655_v42 = vpop.f32.mrb[41].mxu1 }
0x1484   : > { %v3961_v43 = vmax.f32 %v3958_v41, 0.0 }
0x1486   : > { %4665 = vmatmul.mubr.msk.f32.vlgmr.msra.gmra.mrb[36].mxu0 %vm568_vm1, %v3961_v43 }
0x1559   : > { %v4044_v46 = vpop.f32.mrb[36].mxu0 }
0x155a   : > { %v4045_v47 = vadd.f32 %v4305_v45, %v4044_v46  ;;  %v4666_v48 = vpop.f32.mrb[37].mxu0 }
0x155c   : > { %v4048_v49 = vadd.f32 %v4045_v47, %v3874_v36 }
0x155e   : > { %v4053_v50 = vsel %vm568_vm1, %v4048_v49, 0.0 }
0x155f   : > { %4054 = vadd.xlane.f32.xlu0 %v4053_v50 }
0x15ec   : > { %v4055_v51 = vpop.xlane.xlu0 %4054 }
0x15ed   : > { %v4056_v13 = vmul.f32 0.03125, %v4055_v51 }
0x15ef   : > { %v4057_v53 = vsub.f32 %v4048_v49, %v4056_v13 }
0x15f1   : > { %v4058_v54 = vmul.f32 %v4057_v53, %v4057_v53 }
0x15f3   : > { %v4059_v55 = vsel %vm568_vm1, %v4058_v54, 0.0 }
0x15f4   : > { %4060 = vadd.xlane.f32.xlu0 %v4059_v55 }
0x1681   : > { %v4061_v56 = vpop.xlane.xlu0 %4060 }
0x1682   : > { %v4062_v57 = vmul.f32 0.03125, %v4061_v56 }
0x1684   : > { %v4063_v10 = vadd.f32 1e-05, %v4062_v57 }
0x1686   : > { %4917 = vrsqrt.f32 %v4063_v10 }
0x1690   : > { %v4918_v58 = vpop.eup %4917 }
0x1691   : > { %v4065_v60 = vmul.f32 %v4918_v58, %v4057_v53 }
0x1693   : > { %v4072_v62 = vmul.f32 %v4309_v59, %v4065_v60 }
0x1695   : > { %v4079_v63 = vadd.f32 %v4310_v61, %v4072_v62 }
0x1697   : > { %4080 = vst.msk [vmem:[%s553_s1] sm:$0xff] %vm568_vm1, %v4079_v63 }
0x1698   : > { %5102 = shalt.err (!%p5099_p9)
}
0x1699   : > { %s5103_s0 = scalar_lea.hbm %s6006_s3, 128  ;;  %s5107_s13 = scalar_lea.hbm %s6164_s2, 256 }
0x169a   : > { %p5104_p6 = scmp.ne.s32.totalorder %s6006_s3, %s5103_s0  ;;  %p5108_p8 = scmp.lt.u32.totalorder %s6006_s3, %s6164_s2 }
0x169b   : > { %p5109_p10 = scmp.lt.u32.totalorder %s5107_s13, %s5103_s0  ;;  %p5111_p11 = scmp.lt.u32.totalorder %s5103_s0, %s6006_s3 }
0x169c   : > { %p5105_p0 = pnand %p5104_p6, %p6165_p13 }
0x169d   : > { %p5110_p12 = por %p5109_p10, %p5108_p8 }
0x169e   : > { %p5106_p2 = pneg %p5105_p0 }
0x169f   : > { %p5112_p5 = por %p5111_p11, %p5110_p12 }
0x16a1   : > { %p5113_p7 = pnand %p5112_p5, %p5106_p2 }
0x16a3   : > { %5116 = shalt.err (!%p5113_p7)
}
0x16a4   : > { %4737 = dma.vmem_to_hbm [thread:$0]  (%p6165_p13), %s6008_s26, 128, %s6006_s3, %s4082_s28  }
0x16a5 PF: > { %s4107_s23 = sand.u32 1, %s5155_s29   ;;  %p6166_p4 = scmp.ne.s32.totalorder %s6121_s17, 0 }
0x16a6   : > { %p6167_p1 = scmp.ge.s32.totalorder %s5167_s16, 2  ;;  %s4108_s19 = scalar_lea.sflag [#allocation4], %s4107_s23 }
0x16a8   : > { %p4760_p3 = pnand %p6167_p1, %p6166_p4 }
0x16aa   : > { %5150 = dma.done.wait (!%p4760_p3), %s4108_s19, 128  }
0x16ab   : > { %5152 = vsyncadd (!%p4760_p3), %s4108_s19, 4294967168  ;;  %p30_p9 = scmp.ge.s32.totalorder %s5449_s21, 4   ;;  %s6168_s29 = smov %s5159_s30 }
0x16ac   : > { %s6169_s30 = smov %s5163_s15  ;;  %s6170_s15 = smov %s5461_s14 }
0x16ad   : > { %s6171_s16 = smov %s5449_s21  ;;  %32 = sbr.rel (!%p30_p9) target bundleno = 19 (0x13), region = 153 }
0x16b4   :  { %4113 = vsyncpa [#allocation3], 1 }
0x16b5   :  { %4115 = vsyncpa [#allocation3 + $0x1], 1 }
0x16b6   :  { %4116 = vsyncpa [#allocation6], 1 }
0x16b7   :  { %4117 = vsyncpa [#allocation9], 1 }
0x16b8   :  { %4118 = vsyncpa [#allocation12], 1 }
0x16b9   :  { %4119 = vsyncpa [#allocation4], 1 }
0x16ba   :  { %4121 = vsyncpa [#allocation4 + $0x1], 1 }

</bundles_post_ra>
